<compile_context>
chip_gen: v7x
topology: tpu7x:2x2x1
jax: 0.10.0
libtpu: 0.0.40
codegen_flags: <defaults>
</compile_context>

<pallas_src>
import functools

import jax
import jax.numpy as jnp
from jax import lax
from jax.experimental import pallas as pl
from jax.experimental.pallas import tpu as pltpu


def _round_up(x, m):
    return ((x + m - 1) // m) * m


def _direct_conv_bn_act(xp, w2d, shift, *, N, Ho_p, Wo, Cin, Cp, K, stride,
                        dilation, TR, activation, leaky_slope):
    """xp   : (N, Hp, Wp, Cin)  bf16  (spatially padded, NHWC)
       w2d  : (K*K*Cin, Cp)     bf16  (BN scale folded, im2col (kh,kw,cin) order)
       shift: (1, Cp)           f32   (BN shift + folded conv bias, padded)
       returns (N, Ho_p, Wo, Cp) bf16."""
    Hp, Wp = xp.shape[1], xp.shape[2]
    R = Ho_p // TR
    KKC = K * K * Cin
    row_step = TR * stride

    def kernel(x_ref, w_ref, shift_ref, o_ref):
        r = pl.program_id(1)
        row0 = r * row_step
        if row_step % 8 == 0:
            row0 = pl.multiple_of(row0, 8)

        # Build the im2col LHS once per row block, in VMEM: (TR*Wo, K*K*Cin) bf16.
        parts = []
        for kh in range(K):
            for kw in range(K):
                h0 = row0 + kh * dilation
                w0 = kw * dilation
                if stride == 1:
                    patch = x_ref[:, pl.ds(h0, TR), pl.ds(w0, Wo), :]
                else:
                    # TODO(synk): stride>1 uses a strided second-minor read;
                    #             a host-side space-to-depth pre-pack would give
                    #             contiguous loads instead.
                    patch = x_ref[:, pl.ds(h0, TR, stride), pl.ds(w0, Wo, stride), :]
                parts.append(patch.reshape(TR * Wo, Cin))
        lhs = jnp.concatenate(parts, axis=-1)                   # (TR*Wo, KKC) bf16

        # Single MXU matmul with a K*K*Cin contraction (no per-tap accumulator).
        acc = jnp.dot(lhs, w_ref[...], preferred_element_type=jnp.float32)

        # BN shift + activation epilogue in f32, then bf16 lane-dense store.
        y = acc + shift_ref[...]
        if activation == 'relu':
            y = jnp.maximum(y, 0.0)
        elif activation == 'leaky':
            y = jnp.where(y > 0.0, y, leaky_slope * y)
        elif activation == 'mish':
            y = y * jnp.tanh(jax.nn.softplus(y))
        # 'linear': no-op
        o_ref[...] = y.reshape(1, TR, Wo, Cp).astype(o_ref.dtype)

    # VMEM budget derived from the chip's real capacity (v7x: 64 MiB per TC).
    try:
        vmem_cap = int(pltpu.get_tpu_info().vmem_capacity_bytes)
    except Exception:
        vmem_cap = 64 * 1024 * 1024
    block_bytes = (2 * Hp * Wp * Cin * 2          # resident image, double-buffered, bf16
                   + 2 * KKC * Cp * 2             # folded weights, double-buffered, bf16
                   + 2 * Cp * 4                   # shift
                   + 2 * TR * Wo * Cp * 2         # bf16 output block, double-buffered
                   + TR * Wo * (KKC * 2 + Cp * 4))  # in-kernel LHS + f32 matmul result
    vmem_limit = int(min(vmem_cap - 8 * 1024 * 1024,
                         max(32 * 1024 * 1024, 2 * block_bytes)))

    flops = 2 * N * Ho_p * Wo * KKC * Cp
    bytes_accessed = (N * Hp * Wp * Cin * 2 + KKC * Cp * 2 + Cp * 4
                      + N * Ho_p * Wo * Cp * 2)

    return pl.pallas_call(
        kernel,
        out_shape=jax.ShapeDtypeStruct((N, Ho_p, Wo, Cp), jnp.bfloat16),
        grid_spec=pltpu.PrefetchScalarGridSpec(
            num_scalar_prefetch=0,
            grid=(N, R),
            in_specs=[
                # Whole padded image per batch element; the block index only
                # depends on n, so Pallas DMAs it once per n and reuses it
                # across the row blocks.
                pl.BlockSpec((1, Hp, Wp, Cin), lambda n, r: (n, 0, 0, 0)),
                pl.BlockSpec((KKC, Cp), lambda n, r: (0, 0)),
                pl.BlockSpec((1, Cp), lambda n, r: (0, 0)),
            ],
            out_specs=pl.BlockSpec((1, TR, Wo, Cp), lambda n, r: (n, r, 0, 0)),
        ),
        compiler_params=pltpu.CompilerParams(
            dimension_semantics=("parallel", "parallel"),
            vmem_limit_bytes=vmem_limit,
        ),
        cost_estimate=pl.CostEstimate(flops=flops, transcendentals=0,
                                      bytes_accessed=bytes_accessed),
    )(xp, w2d, shift)


def conv_bn_activation(x_nchw, weight_oihw, gamma, beta, running_mean,
                       running_var, *, stride=1, dilation=1, groups=1, bias=None,
                       eps=1e-5, activation='relu', leaky_slope=0.1, target_m=1024):
    """Conv2d('same' pad for odd K) + BatchNorm2d(eval) + activation.  NCHW in/out."""
    assert groups == 1, "TODO(synk): grouped conv not implemented"
    N, Cin, H, W = x_nchw.shape
    Cout, Cin_w, K, K2 = weight_oihw.shape
    assert Cin == Cin_w and K == K2
    pad = (K - 1) // 2
    Ho = (H + 2 * pad - dilation * (K - 1) - 1) // stride + 1
    Wo = (W + 2 * pad - dilation * (K - 1) - 1) // stride + 1

    # Fold eval-mode BN into an affine scale/shift; fold scale into the weight
    # and any conv bias into the shift.
    scale = gamma / jnp.sqrt(running_var + eps)
    shift = beta - running_mean * scale
    if bias is not None:
        shift = shift + bias * scale

    Cp = max(128, _round_up(Cout, 128))             # lane-dense output channels

    # cdiv row tiling: pad Ho up to R*TR so every grid step has M ~= target_m.
    TR = max(1, min(Ho, target_m // max(1, Wo)))
    R = -(-Ho // TR)
    Ho_p = R * TR

    # NHWC bf16 internal layout; spatial zero-pad (+ extra bottom rows so the
    # ragged last row block's reads stay in bounds; extra rows are sliced off).
    # TODO(synk): if the surrounding model can run channels-last, accept/return
    #             NHWC and drop these two transposes (one full HBM pass each).
    x_nhwc = jnp.transpose(x_nchw, (0, 2, 3, 1)).astype(jnp.bfloat16)
    Hp_needed = (Ho_p - 1) * stride + dilation * (K - 1) + 1
    extra_h = max(0, Hp_needed - (H + 2 * pad))
    xp = jnp.pad(x_nhwc, ((0, 0), (pad, pad + extra_h), (pad, pad), (0, 0)))

    # Folded weight -> im2col layout (K*K*Cin, Cp), bf16 (row order = kh,kw,cin,
    # matching the kernel's concat order).
    w = weight_oihw * scale[:, None, None, None]                    # (Cout,Cin,K,K)
    w = jnp.transpose(w, (2, 3, 1, 0))                              # (K,K,Cin,Cout)
    w = jnp.pad(w, ((0, 0), (0, 0), (0, 0), (0, Cp - Cout)))
    w2d = w.reshape(K * K * Cin, Cp).astype(jnp.bfloat16)
    shift_p = jnp.pad(shift, (0, Cp - Cout)).reshape(1, Cp).astype(jnp.float32)

    y = _direct_conv_bn_act(xp, w2d, shift_p, N=N, Ho_p=Ho_p, Wo=Wo, Cin=Cin,
                            Cp=Cp, K=K, stride=stride, dilation=dilation, TR=TR,
                            activation=activation, leaky_slope=leaky_slope)
    y = y[:, :Ho, :, :Cout]                                         # drop padding
    return jnp.transpose(y, (0, 3, 1, 2)).astype(jnp.float32)       # back to NCHW


# ------------------------------ references -----------------------------------
def _reference_f32(x, weight, gamma, beta, mean, var, *, stride, dilation, eps=1e-5):
    pad = (weight.shape[-1] - 1) // 2
    y = lax.conv_general_dilated(
        x, weight, (stride, stride), [(pad, pad), (pad, pad)],
        rhs_dilation=(dilation, dilation),
        dimension_numbers=("NCHW", "OIHW", "NCHW"))
    s = (gamma / jnp.sqrt(var + eps)).reshape(1, -1, 1, 1)
    b = (beta - mean * gamma / jnp.sqrt(var + eps)).reshape(1, -1, 1, 1)
    return jnp.maximum(y * s + b, 0.0)


def _reference_bf16(x, weight, gamma, beta, mean, var, *, stride, dilation, eps=1e-5):
    # Same bf16-input / f32-accumulate / bf16-output numerics as the kernel.
    pad = (weight.shape[-1] - 1) // 2
    scale = gamma / jnp.sqrt(var + eps)
    shift = beta - mean * scale
    w_s = (weight * scale[:, None, None, None]).astype(jnp.bfloat16)
    xb = x.astype(jnp.bfloat16)
    y = lax.conv_general_dilated(
        xb, w_s, (stride, stride), [(pad, pad), (pad, pad)],
        rhs_dilation=(dilation, dilation),
        dimension_numbers=("NCHW", "OIHW", "NCHW"),
        preferred_element_type=jnp.float32)
    y = jnp.maximum(y + shift.reshape(1, -1, 1, 1), 0.0)
    return y.astype(jnp.bfloat16).astype(jnp.float32)


# --------------------------------- main ---------------------------------------
if __name__ == "__main__":
    key = jax.random.PRNGKey(0)
    k_x, k_w, k_g, k_b, k_m, k_v = jax.random.split(key, 6)

    # ConvBnActivation(in_channels=4, out_channels=8, kernel_size=3, stride=1,
    #                  bias=False, bn=True, activation='relu')
    N, Cin, H, W = 2, 4, 16, 16
    Cout, K, stride, dilation = 8, 3, 1, 1

    x = jax.random.normal(k_x, (N, Cin, H, W), jnp.float32)
    weight = jax.random.normal(k_w, (Cout, Cin, K, K), jnp.float32) * 0.1
    gamma = jax.random.uniform(k_g, (Cout,), jnp.float32, 0.5, 1.5)
    beta = jax.random.normal(k_b, (Cout,), jnp.float32) * 0.1
    running_mean = jax.random.normal(k_m, (Cout,), jnp.float32) * 0.1
    running_var = jax.random.uniform(k_v, (Cout,), jnp.float32, 0.5, 1.5)

    fn = jax.jit(functools.partial(conv_bn_activation, stride=stride, dilation=dilation))
    out = jax.block_until_ready(fn(x, weight, gamma, beta, running_mean, running_var))

    assert out.shape == (N, Cout, H, W), out.shape

    ref_b = _reference_bf16(x, weight, gamma, beta, running_mean, running_var,
                            stride=stride, dilation=dilation)
    ref_f = _reference_f32(x, weight, gamma, beta, running_mean, running_var,
                           stride=stride, dilation=dilation)
    err_b = float(jnp.max(jnp.abs(out - ref_b)))   # matched bf16 numerics -> tight
    err_f = float(jnp.max(jnp.abs(out - ref_f)))   # vs full f32 -> loose sanity
    assert err_b < 8e-2, err_b
    assert err_f < 2e-1, err_f

    print("KERNEL_OK")
</pallas_src>

<mosaic_0001>
module attributes {stable_mosaic.version = 11 : i64} {
  func.func @kernel(%arg0: i32, %arg1: i32, %arg2: memref<1x18x18x4xbf16, #tpu.memory_space<vmem>>, %arg3: memref<36x128xbf16, #tpu.memory_space<vmem>>, %arg4: memref<1x128xf32, #tpu.memory_space<vmem>>, %arg5: memref<1x16x16x128xbf16, #tpu.memory_space<vmem>>) attributes {dimension_semantics = [#tpu.dimension_semantics<parallel>, #tpu.dimension_semantics<parallel>], iteration_bounds = array<i64: 2, 1>, scalar_prefetch = 0 : i64, scratch_operands = 0 : i64, tpu.core_type = #tpu.core_type<tc>, window_params = [{transform_indices = @transform_0, window_bounds = array<i64: 1, 18, 18, 4>}, {pipeline_mode = #tpu.pipeline_mode<synchronous>, transform_indices = @transform_1, window_bounds = array<i64: 36, 128>}, {pipeline_mode = #tpu.pipeline_mode<synchronous>, transform_indices = @transform_2, window_bounds = array<i64: 1, 128>}, {transform_indices = @transform_3, window_bounds = array<i64: 1, 16, 16, 128>}]} {
    %c16_i32 = arith.constant 16 : i32
    %0 = arith.muli %arg1, %c16_i32 : i32
    %1 = tpu.assume_multiple %0, 8 : i32
    %c0_i32 = arith.constant 0 : i32
    %2 = arith.addi %1, %c0_i32 : i32
    %c0 = arith.constant 0 : index
    %3 = arith.index_cast %2 : i32 to index
    %c0_0 = arith.constant 0 : index
    %c0_1 = arith.constant 0 : index
    %4 = vector.load %arg2[%c0, %3, %c0_0, %c0_1] : memref<1x18x18x4xbf16, #tpu.memory_space<vmem>>, vector<1x16x16x4xbf16>
    %5 = vector.shape_cast %4 : vector<1x16x16x4xbf16> to vector<256x4xbf16>
    %c0_i32_2 = arith.constant 0 : i32
    %6 = arith.addi %1, %c0_i32_2 : i32
    %c0_3 = arith.constant 0 : index
    %7 = arith.index_cast %6 : i32 to index
    %c1 = arith.constant 1 : index
    %c0_4 = arith.constant 0 : index
    %8 = vector.load %arg2[%c0_3, %7, %c1, %c0_4] : memref<1x18x18x4xbf16, #tpu.memory_space<vmem>>, vector<1x16x16x4xbf16>
    %9 = vector.shape_cast %8 : vector<1x16x16x4xbf16> to vector<256x4xbf16>
    %c0_i32_5 = arith.constant 0 : i32
    %10 = arith.addi %1, %c0_i32_5 : i32
    %c0_6 = arith.constant 0 : index
    %11 = arith.index_cast %10 : i32 to index
    %c2 = arith.constant 2 : index
    %c0_7 = arith.constant 0 : index
    %12 = vector.load %arg2[%c0_6, %11, %c2, %c0_7] : memref<1x18x18x4xbf16, #tpu.memory_space<vmem>>, vector<1x16x16x4xbf16>
    %13 = vector.shape_cast %12 : vector<1x16x16x4xbf16> to vector<256x4xbf16>
    %c1_i32 = arith.constant 1 : i32
    %14 = arith.addi %1, %c1_i32 : i32
    %c0_8 = arith.constant 0 : index
    %15 = arith.index_cast %14 : i32 to index
    %c0_9 = arith.constant 0 : index
    %c0_10 = arith.constant 0 : index
    %16 = vector.load %arg2[%c0_8, %15, %c0_9, %c0_10] : memref<1x18x18x4xbf16, #tpu.memory_space<vmem>>, vector<1x16x16x4xbf16>
    %17 = vector.shape_cast %16 : vector<1x16x16x4xbf16> to vector<256x4xbf16>
    %c1_i32_11 = arith.constant 1 : i32
    %18 = arith.addi %1, %c1_i32_11 : i32
    %c0_12 = arith.constant 0 : index
    %19 = arith.index_cast %18 : i32 to index
    %c1_13 = arith.constant 1 : index
    %c0_14 = arith.constant 0 : index
    %20 = vector.load %arg2[%c0_12, %19, %c1_13, %c0_14] : memref<1x18x18x4xbf16, #tpu.memory_space<vmem>>, vector<1x16x16x4xbf16>
    %21 = vector.shape_cast %20 : vector<1x16x16x4xbf16> to vector<256x4xbf16>
    %c1_i32_15 = arith.constant 1 : i32
    %22 = arith.addi %1, %c1_i32_15 : i32
    %c0_16 = arith.constant 0 : index
    %23 = arith.index_cast %22 : i32 to index
    %c2_17 = arith.constant 2 : index
    %c0_18 = arith.constant 0 : index
    %24 = vector.load %arg2[%c0_16, %23, %c2_17, %c0_18] : memref<1x18x18x4xbf16, #tpu.memory_space<vmem>>, vector<1x16x16x4xbf16>
    %25 = vector.shape_cast %24 : vector<1x16x16x4xbf16> to vector<256x4xbf16>
    %c2_i32 = arith.constant 2 : i32
    %26 = arith.addi %1, %c2_i32 : i32
    %c0_19 = arith.constant 0 : index
    %27 = arith.index_cast %26 : i32 to index
    %c0_20 = arith.constant 0 : index
    %c0_21 = arith.constant 0 : index
    %28 = vector.load %arg2[%c0_19, %27, %c0_20, %c0_21] : memref<1x18x18x4xbf16, #tpu.memory_space<vmem>>, vector<1x16x16x4xbf16>
    %29 = vector.shape_cast %28 : vector<1x16x16x4xbf16> to vector<256x4xbf16>
    %c2_i32_22 = arith.constant 2 : i32
    %30 = arith.addi %1, %c2_i32_22 : i32
    %c0_23 = arith.constant 0 : index
    %31 = arith.index_cast %30 : i32 to index
    %c1_24 = arith.constant 1 : index
    %c0_25 = arith.constant 0 : index
    %32 = vector.load %arg2[%c0_23, %31, %c1_24, %c0_25] : memref<1x18x18x4xbf16, #tpu.memory_space<vmem>>, vector<1x16x16x4xbf16>
    %33 = vector.shape_cast %32 : vector<1x16x16x4xbf16> to vector<256x4xbf16>
    %c2_i32_26 = arith.constant 2 : i32
    %34 = arith.addi %1, %c2_i32_26 : i32
    %c0_27 = arith.constant 0 : index
    %35 = arith.index_cast %34 : i32 to index
    %c2_28 = arith.constant 2 : index
    %c0_29 = arith.constant 0 : index
    %36 = vector.load %arg2[%c0_27, %35, %c2_28, %c0_29] : memref<1x18x18x4xbf16, #tpu.memory_space<vmem>>, vector<1x16x16x4xbf16>
    %37 = vector.shape_cast %36 : vector<1x16x16x4xbf16> to vector<256x4xbf16>
    %38 = tpu.concatenate %5, %9, %13, %17, %21, %25, %29, %33, %37 in 1 : vector<256x4xbf16>, vector<256x4xbf16>, vector<256x4xbf16>, vector<256x4xbf16>, vector<256x4xbf16>, vector<256x4xbf16>, vector<256x4xbf16>, vector<256x4xbf16>, vector<256x4xbf16> -> vector<256x36xbf16>
    %c0_30 = arith.constant 0 : index
    %c0_31 = arith.constant 0 : index
    %39 = vector.load %arg3[%c0_30, %c0_31] : memref<36x128xbf16, #tpu.memory_space<vmem>>, vector<36x128xbf16>
    %cst = arith.constant dense<0.000000e+00> : vector<256x128xf32>
    %40 = tpu.matmul %38, %39, %cst {dimension_numbers = #tpu.dot_dimension_numbers<[1], [0], [0], [1], [0, 0, 1, 1], [], []>} : vector<256x36xbf16>, vector<36x128xbf16>, vector<256x128xf32> -> vector<256x128xf32>
    %c0_32 = arith.constant 0 : index
    %c0_33 = arith.constant 0 : index
    %41 = vector.load %arg4[%c0_32, %c0_33] : memref<1x128xf32, #tpu.memory_space<vmem>>, vector<1x128xf32>
    %42 = vector.broadcast %41 : vector<1x128xf32> to vector<256x128xf32>
    %43 = arith.addf %40, %42 : vector<256x128xf32>
    %cst_34 = arith.constant 0.000000e+00 : f32
    %44 = vector.broadcast %cst_34 : f32 to vector<256x128xf32>
    %45 = arith.maximumf %43, %44 : vector<256x128xf32>
    %46 = vector.shape_cast %45 : vector<256x128xf32> to vector<1x16x16x128xf32>
    %47 = arith.truncf %46 : vector<1x16x16x128xf32> to vector<1x16x16x128xbf16>
    %c0_35 = arith.constant 0 : index
    %c0_36 = arith.constant 0 : index
    %c0_37 = arith.constant 0 : index
    %c0_38 = arith.constant 0 : index
    %48 = vector.load %arg5[%c0_35, %c0_36, %c0_37, %c0_38] : memref<1x16x16x128xbf16, #tpu.memory_space<vmem>>, vector<1x16x16x128xbf16>
    tpu.vector_store %arg5[%c0_35, %c0_36, %c0_37, %c0_38], %47 {strides = array<i32>} : memref<1x16x16x128xbf16, #tpu.memory_space<vmem>>, vector<1x16x16x128xbf16>,
    return
  }
  func.func @transform_0(%arg0: i32, %arg1: i32) -> (i32, i32, i32, i32) {
    %c0_i32 = arith.constant 0 : i32
    %c0_i32_0 = arith.constant 0 : i32
    %c0_i32_1 = arith.constant 0 : i32
    %c0_i32_2 = arith.constant 0 : i32
    return %arg0, %c0_i32, %c0_i32_0, %c0_i32_1 : i32, i32, i32, i32
  }
  func.func @transform_1(%arg0: i32, %arg1: i32) -> (i32, i32) {
    %c0_i32 = arith.constant 0 : i32
    %c0_i32_0 = arith.constant 0 : i32
    %c0_i32_1 = arith.constant 0 : i32
    return %c0_i32, %c0_i32_0 : i32, i32
  }
  func.func @transform_2(%arg0: i32, %arg1: i32) -> (i32, i32) {
    %c0_i32 = arith.constant 0 : i32
    %c0_i32_0 = arith.constant 0 : i32
    %c0_i32_1 = arith.constant 0 : i32
    return %c0_i32, %c0_i32_0 : i32, i32
  }
  func.func @transform_3(%arg0: i32, %arg1: i32) -> (i32, i32, i32, i32) {
    %c0_i32 = arith.constant 0 : i32
    %c0_i32_0 = arith.constant 0 : i32
    %c0_i32_1 = arith.constant 0 : i32
    return %arg0, %arg1, %c0_i32, %c0_i32_0 : i32, i32, i32, i32
  }
}

</mosaic_0001>

<bundles_post_ra>
// kernel: conv_bn_activation.1
= control target key start
LH: loop header
LB: loop body
LE: loop exit
PB: predicated region body
PF: predicated region fallthrough
CT: control target
= control target key end

     0   :  { %s4308_s12 = smov 0   ;;  %s4310_s13 = smov 0   ;;  %s6205_s0 = inlined_call_operand.vmem [shape: bf16[2,18,18,4], index: 0, kind: input, shape index: {}]   ;;  %s6206_s1 = inlined_call_operand.vmem [shape: bf16[36,128], index: 1, kind: input, shape index: {}]   ;;  %s6207_s2 = inlined_call_operand.vmem [shape: f32[1,128], index: 2, kind: input, shape index: {}]   ;;  %s6208_s3 = inlined_call_operand.vmem [shape: bf16[2,16,16,128], index: 3, kind: output, shape index: {}]  }
   0x1   :  { %s4312_s14 = smov 0  }
   0x2 LB: > { %s25_s15 = sadd.s32 1, %s4274_s13  ;;  %p3573_p0 = scmp.ge.s32.totalorder %s4278_s14, 1  ;;  %s4278_s14 = sphi %s4312_s14, %s13_s14   ;;  %s4274_s13 = sphi %s4310_s13, %s6214_s13   ;;  %s4270_s12 = sphi %s4308_s12, %s6213_s12  }
   0x3   : > { %p27_p1 = scmp.ge.s32.totalorder %s25_s15, 2  ;;  %p151_p2 = scmp.lt.s32.totalorder %s4278_s14, 3 }
   0x5   : > { %s6216_s15 = smov (%p27_p1, %s25_s15), 0  ;;  %p152_p3 = pnand %p3573_p0, %p151_p2 }
   0x6   : > { %p180_p4 = scmp.lt.s32.totalorder (!%p152_p3), %s4270_s12, 1  ;;  %vm700_vm0 = vcmask (!%p152_p3), 1042432   ;;  %vm701_vm1 = vcmask (!%p152_p3), 1046532   ;;  %s4280_s20 = smov (!%p152_p3), 12   ;;  %vm249_vm3 = vsmask.f32 (!%p152_p3), 3328 }
   0x7   : > { %155 = sbr.rel (%p152_p3) target bundleno = 679 (0x2a7), region = 32  ;;  %vm4363_vm2 = vmor (!%p152_p3), %vm700_vm0, %vm701_vm1  ;;  %vm250_vm4 = vsmask.f32 (!%p152_p3), 7440  ;;  %s4281_s21 = smov (!%p152_p3), 8   ;;  %vm2775_vm6 = vcmask (!%p152_p3), 31744   ;;  %vm2824_vm7 = vcmask (!%p152_p3), 64512  }
   0x8   : > { %vm4421_vm5 = vmor (!%p152_p3), %vm249_vm3, %vm250_vm4  ;;  %s4282_s22 = smov (!%p152_p3), 4   ;;  %s4283_s23 = smov (!%p152_p3), 16   ;;  %vm2857_vm8 = vcmask (!%p152_p3), 97280   ;;  %vm2890_vm9 = vcmask (!%p152_p3), 130048   ;;  %vm2923_vm10 = vcmask (!%p152_p3), 162816   ;;  %vm2956_vm11 = vcmask (!%p152_p3), 195584  }
   0x9   : > { %s4284_s24 = smov (!%p152_p3), 20   ;;  %s4285_s25 = smov (!%p152_p3), 24   ;;  %vm2989_vm12 = vcmask (!%p152_p3), 228352   ;;  %vm3022_vm13 = vcmask (!%p152_p3), 261120   ;;  %vm3082_vm14 = vcmask (!%p152_p3), 293888   ;;  %vm3115_vm15 = vcmask (!%p152_p3), 1041408  }
   0xa   : > { %s4286_s26 = smov (!%p152_p3), 28   ;;  %s4287_s27 = smov (!%p152_p3), 32  }
   0xe   : > { %s6218_s12 = smov (!%p180_p4, %s4270_s12), 1 }
   0xf   : > { %s4144_s16 = smul.u32 216, %s6218_s12  ;;  %s3951_s9 = sshll.u32 %s6218_s12, 7 }
  0x10   : > { %s6153_s12 = scalar_lea.vmem %s6208_s3, %s3951_s9 }
  0x11   : > { %s4332_s19 = scalar_lea.vmem %s6205_s0, %s4144_s16 }
  0x12   : > { %v3609_v0 = vld [vmem:[%s4332_s19 + $0x6c] sm:$0xf]  ;;  %v4336_v1 = vld [vmem:[%s4332_s19 + $0x70] sm:$0xf]  ;;  %v4349_v12 = vld [vmem:[%s4332_s19 + $0x64] sm:$0xf] }
  0x13   : > { %v3593_v2 = vld [vmem:[%s4332_s19 + $0xc] sm:$0xf]  ;;  %v1069_v3 = vshll.u32 %v4336_v1, 16  ;;  %v1073_v4 = vshrl.u32 %v4336_v1, 16  ;;  %v3809_v5 = vcombine.low %v3609_v0, %v4336_v1  ;;  %v1060_v6 = vshrl.u32 %v3609_v0, 16 }
  0x14   : > { %v4343_v7 = vld [vmem:[%s4332_s19 + $0x10] sm:$0xf]  ;;  %v1063_v8 = vshll.u32 %v3609_v0, 16  ;;  %v868_v15 = vshrl.u32 %v3593_v2, 16  ;;  %v871_v16 = vshll.u32 %v3593_v2, 16  ;;  %v761_v22 = vrot.slane %v4349_v12, 5 }
  0x15   : > { %v877_v9 = vshll.u32 %v4343_v7, 16  ;;  %v881_v10 = vshrl.u32 %v4343_v7, 16  ;;  %v3801_v11 = vcombine.low %v3593_v2, %v4343_v7  ;;  %v4351_v13 = vrot.slane %v1073_v4, 4  ;;  %2343 = vrot.lane.b32.xlu1 %v3809_v5, %s4280_s20  ;;  %v4355_v17 = vld [vmem:[%s4332_s19 + $0x68] sm:$0x1] }
  0x16   : > { %v1062_v14 = vrot.slane %v1060_v6, 4  ;;  %v1065_v18 = vrot.slane %v1063_v8, 5  ;;  %v644_v20 = vld [vmem:[%s4332_s19 + $0x60] sm:$0xe]  ;;  %v764_v23 = vrot.slane %v4355_v17, 5  ;;  %v870_v24 = vrot.slane %v868_v15, 4 }
  0x17   : > { %v4357_v19 = vrot.slane %v881_v10, 4  ;;  %2327 = vrot.lane.b32.xlu0 %v3801_v11, %s4280_s20  ;;  %v873_v25 = vrot.slane %v871_v16, 5  ;;  %v3585_v26 = vrot.slane %v644_v20, 9  ;;  %v4370_v27 = vld [vmem:[%s4332_s19 + $0x4] sm:$0xf]  ;;  %v454_v28 = vshll.u32 %v4349_v12, 16 }
  0x18   : > { %v1066_v29 = vor.u32 %v1065_v18, %v1062_v14  ;;  %v763_v30 = vrot.slane %v761_v22, 4  ;;  %v4374_v31 = vld [vmem:[%s4332_s19 + $0x8] sm:$0x1]  ;;  %v636_v32 = vld [vmem:[%s4332_s19] sm:$0xe]  ;;  %v705_v33 = vrot.slane %v4370_v27, 5 }
  0x19   : > { %v874_v34 = vor.u32 %v873_v25, %v870_v24  ;;  %v762_v35 = vsel %vm4363_vm2, %v3585_v26, %v761_v22  ;;  %v3577_v36 = vrot.slane %v636_v32, 9  ;;  %v708_v37 = vrot.slane %v4374_v31, 5  ;;  %v4382_v38 = vld [vmem:[%s4332_s19 + $0x70] sm:$0xf]  ;;  %v4385_v39 = vld [vmem:[%s4332_s19 + $0x74] sm:$0x1] }
  0x1a   : > { %v4387_v40 = vrot.slane %v1066_v29, 4  ;;  %v765_v41 = vsel %vm4363_vm2, %v763_v30, %v764_v23  ;;  %v707_v42 = vrot.slane %v705_v33, 4  ;;  %v645_v43 = vld [vmem:[%s4332_s19 + $0x6c] sm:$0xe]  ;;  %v768_v44 = vrot.slane %v4382_v38, 5 }
  0x1b   : > { %v4393_v45 = vrot.slane %v874_v34, 4  ;;  %v3793_v46 = vcombine.low %v762_v35, %v765_v41  ;;  %v706_v47 = vsel %vm4363_vm2, %v3577_v36, %v705_v33  ;;  %v3586_v48 = vrot.slane %v645_v43, 9  ;;  %v204_v49 = vld [vmem:[%s4332_s19 + $0x10] sm:$0xf]  ;;  %v234_v50 = vld [vmem:[%s4332_s19 + $0x14] sm:$0x1] }
  0x1c   : > { %v709_v51 = vsel %vm4363_vm2, %v707_v42, %v708_v37  ;;  %v770_v52 = vrot.slane %v768_v44, 4  ;;  %v771_v53 = vrot.slane %v4385_v39, 5  ;;  %v637_v54 = vld [vmem:[%s4332_s19 + $0xc] sm:$0xe]  ;;  %v712_v55 = vrot.slane %v204_v49, 5 }
  0x1d   : > { %2247 = vrot.lane.b32.xlu1 %v3793_v46, %s4281_s21  ;;  %v3785_v56 = vcombine.low %v706_v47, %v709_v51  ;;  %v769_v57 = vsel %vm4363_vm2, %v3586_v48, %v768_v44  ;;  %v3578_v58 = vrot.slane %v637_v54, 9  ;;  %v715_v59 = vrot.slane %v234_v50, 5  ;;  %v203_v60 = vld [vmem:[%s4332_s19 + $0xc] sm:$0xf]  ;;  %v201_v2 = vld [vmem:[%s4332_s19] sm:$0xf] }
  0x1e   : > { %v772_v61 = vsel %vm4363_vm2, %v770_v52, %v771_v53  ;;  %v714_v62 = vrot.slane %v712_v55, 4  ;;  %v277_v63 = vshrl.u32 %v203_v60, 16  ;;  %v280_v0 = vshll.u32 %v203_v60, 16  ;;  %v219_v23 = vld [vmem:[%s4332_s19 + $0x6c] sm:$0xf] }
  0x1f   : > { %2231 = vrot.lane.b32.xlu0 %v3785_v56, %s4281_s21  ;;  %v3794_v4 = vcombine.low %v769_v57, %v772_v61  ;;  %v713_v5 = vsel %vm4363_vm2, %v3578_v58, %v712_v55  ;;  %v286_v6 = vshll.u32 %v204_v49, 16  ;;  %v290_v8 = vshrl.u32 %v204_v49, 16  ;;  %v217_v52 = vld [vmem:[%s4332_s19 + $0x60] sm:$0xf] }
  0x20   : > { %v716_v10 = vsel %vm4363_vm2, %v714_v62, %v715_v59  ;;  %v279_v11 = vrot.slane %v277_v63, 4  ;;  %v282_v14 = vrot.slane %v280_v0, 5  ;;  %v296_v15 = vshll.u32 %v234_v50, 16 }
  0x21   : > { %2249 = vrot.lane.b32.xlu1 %v3794_v4, %s4281_s21  ;;  %v3786_v16 = vcombine.low %v713_v5, %v716_v10  ;;  %v288_v18 = vrot.slane %v286_v6, 5  ;;  %v292_v20 = vrot.slane %v290_v8, 4  ;;  %v253_v22 = vshrl.u32 %v201_v2, 16  ;;  %v3611_v4 = vld [vmem:[%s4332_s19 + $0x78] sm:$0xf] }
  0x22   : > { %v283_v24 = vor.u32 %v282_v14, %v279_v11  ;;  %v298_v25 = vrot.slane %v296_v15, 5  ;;  %v256_v26 = vshll.u32 %v201_v2, 16  ;;  %v262_v29 = vshll.u32 %v4370_v27, 16  ;;  %v4444_v10 = vld [vmem:[%s4332_s19 + $0x7c] sm:$0xf] }
  0x23   : > { %2233 = vrot.lane.b32.xlu0 %v3786_v16, %s4281_s21  ;;  %v293_v32 = vor.u32 %v292_v20, %v288_v18  ;;  %v255_v33 = vrot.slane %v253_v22, 4  ;;  %v266_v34 = vshrl.u32 %v4370_v27, 16  ;;  %v272_v35 = vshll.u32 %v4374_v31, 16 }
  0x24   : > { %v284_v36 = vrot.slane %v283_v24, 4  ;;  %v258_v37 = vrot.slane %v256_v26, 5  ;;  %v264_v41 = vrot.slane %v262_v29, 5  ;;  %v469_v42 = vshrl.u32 %v219_v23, 16 }
  0x25   : > { %v294_v43 = vrot.slane %v293_v32, 4  ;;  %v268_v44 = vrot.slane %v266_v34, 4  ;;  %v274_v46 = vrot.slane %v272_v35, 5  ;;  %v472_v47 = vshll.u32 %v219_v23, 16  ;;  %v4451_v23 = vld [vmem:[%s4332_s19 + $0x18] sm:$0xf] }
  0x26   : > { %v289_v48 = vsel %vm4421_vm5, %v284_v36, %v288_v18  ;;  %v259_v49 = vor.u32 %v258_v37, %v255_v33  ;;  %v471_v50 = vrot.slane %v469_v42, 4  ;;  %v478_v51 = vshll.u32 %v4382_v38, 16  ;;  %v4462_v35 = vld [vmem:[%s4332_s19 + $0x74] sm:$0x1] }
  0x27   : > { %v299_v27 = vsel %vm4421_vm5, %v294_v43, %v298_v25  ;;  %v269_v31 = vor.u32 %v268_v44, %v264_v41  ;;  %v474_v53 = vrot.slane %v472_v47, 5  ;;  %v482_v54 = vshrl.u32 %v4382_v38, 16 }
  0x28   : > { %v3770_v55 = vcombine.low %v289_v48, %v299_v27  ;;  %v260_v56 = vrot.slane %v259_v49, 4  ;;  %v480_v57 = vrot.slane %v478_v51, 5  ;;  %v488_v58 = vshll.u32 %v4385_v39, 16  ;;  %v4472_v48 = vld [vmem:[%s4332_s19 + $0x14] sm:$0x1] }
  0x29   : > { %v270_v59 = vrot.slane %v269_v31, 4  ;;  %v475_v60 = vor.u32 %v474_v53, %v471_v50  ;;  %v484_v61 = vrot.slane %v482_v54, 4  ;;  %v445_v62 = vshrl.u32 %v217_v52, 16 }
  0x2a   : > { %2153 = vrot.lane.b32.xlu1 %v3770_v55, %s4282_s22  ;;  %v265_v63 = vsel %vm4421_vm5, %v260_v56, %v264_v41  ;;  %v490_v0 = vrot.slane %v488_v58, 5  ;;  %v448_v2 = vshll.u32 %v217_v52, 16  ;;  %v456_v38 = vrot.slane %v454_v28, 5 }
  0x2b   : > { %v275_v39 = vsel %vm4421_vm5, %v270_v59, %v274_v46  ;;  %v476_v5 = vrot.slane %v475_v60, 4  ;;  %v485_v6 = vor.u32 %v484_v61, %v480_v57  ;;  %v447_v8 = vrot.slane %v445_v62, 4 }
  0x2c   : > { %v3769_v11 = vcombine.low %v265_v63, %v275_v39  ;;  %v450_v14 = vrot.slane %v448_v2, 5  ;;  %v458_v15 = vshrl.u32 %v4349_v12, 16  ;;  %v464_v16 = vshll.u32 %v4355_v17, 16  ;;  %v4456_v12 = vld [vmem:[%s4332_s19 + $0x1c] sm:$0xf] }
  0x2d   : > { %v481_v28 = vsel %vm4421_vm5, %v476_v5, %v480_v57  ;;  %v486_v18 = vrot.slane %v485_v6, 4  ;;  %v1084_v20 = vshrl.u32 %v3611_v4, 16  ;;  %v1087_v22 = vshll.u32 %v3611_v4, 16  ;;  %v4488_v57 = vld [vmem:[%s4332_s19 + $0x80] sm:$0x1] }
  0x2e   : > { %2151 = vrot.lane.b32.xlu0 %v3769_v11, %s4282_s22  ;;  %v451_v24 = vor.u32 %v450_v14, %v447_v8  ;;  %v460_v25 = vrot.slane %v458_v15, 4  ;;  %v466_v26 = vrot.slane %v464_v16, 5  ;;  %v1097_v29 = vshrl.u32 %v4444_v10, 16  ;;  %v3649_v8 = vld [vmem:[%s4332_s19 + $0x6c] sm:$0xe] }
  0x2f   : > { %v491_v17 = vsel %vm4421_vm5, %v486_v18, %v490_v0  ;;  %v1086_v32 = vrot.slane %v1084_v20, 4  ;;  %v1089_v33 = vrot.slane %v1087_v22, 5  ;;  %v3810_v34 = vcombine.low %v3611_v4, %v4444_v10  ;;  %v4497_v0 = vld [vmem:[%s4332_s19 + $0x20] sm:$0x1] }
  0x30   : > { %v3778_v36 = vcombine.low %v481_v28, %v491_v17  ;;  %v452_v37 = vrot.slane %v451_v24, 4  ;;  %v461_v41 = vor.u32 %v460_v25, %v456_v38  ;;  %v892_v42 = vshrl.u32 %v4451_v23, 16  ;;  %v3641_v28 = vld [vmem:[%s4332_s19 + $0xc] sm:$0xe]  ;;  %v3650_v17 = vld [vmem:[%s4332_s19 + $0x78] sm:$0xe] }
  0x31   : > { %v895_v43 = vshll.u32 %v4451_v23, 16  ;;  %v905_v44 = vshrl.u32 %v4456_v12, 16  ;;  %v3802_v46 = vcombine.low %v4451_v23, %v4456_v12  ;;  %v1071_v47 = vrot.slane %v1069_v3, 5 }
  0x32   : > { %2169 = vrot.lane.b32.xlu1 %v3778_v36, %s4282_s22  ;;  %v457_v49 = vsel %vm4421_vm5, %v452_v37, %v456_v38  ;;  %v462_v50 = vrot.slane %v461_v41, 4  ;;  %v894_v51 = vrot.slane %v892_v42, 4  ;;  %v1079_v52 = vshll.u32 %v4462_v35, 16 }
  0x33   : > { %v897_v27 = vrot.slane %v895_v43, 5  ;;  %v1072_v31 = vsel %vm4421_vm5, %v4387_v40, %v1071_v47  ;;  %v1076_v53 = vor.u32 %v4351_v13, %v1071_v47  ;;  %v879_v3 = vrot.slane %v877_v9, 5  ;;  %v3642_v47 = vld [vmem:[%s4332_s19 + $0x18] sm:$0xe] }
  0x34   : > { %v467_v54 = vsel %vm4421_vm5, %v462_v50, %v466_v26  ;;  %v1081_v55 = vrot.slane %v1079_v52, 5  ;;  %v887_v56 = vshll.u32 %v4472_v48, 16  ;;  %v1090_v58 = vor.u32 %v1089_v33, %v1086_v32 }
  0x35   : > { %v3777_v59 = vcombine.low %v457_v49, %v467_v54  ;;  %v1077_v60 = vrot.slane %v1076_v53, 4  ;;  %v880_v40 = vsel %vm4421_vm5, %v4393_v45, %v879_v3  ;;  %v884_v13 = vor.u32 %v4357_v19, %v879_v3  ;;  %v4539_v53 = vld [vmem:[%s4332_s19 + $0x7c] sm:$0xf] }
  0x36   : > { %2345 = vrot.lane.b32.xlu1 %v3810_v34, %s4280_s20  ;;  %v889_v9 = vrot.slane %v887_v56, 5  ;;  %v1091_v61 = vrot.slane %v1090_v58, 4  ;;  %v1093_v62 = vshll.u32 %v4444_v10, 16  ;;  %v1099_v63 = vrot.slane %v1097_v29, 4  ;;  %v4546_v58 = vld [vmem:[%s4332_s19 + $0x18] sm:$0xf] }
  0x37   : > { %2167 = vrot.lane.b32.xlu0 %v3777_v59, %s4282_s22  ;;  %v1082_v2 = vsel %vm4421_vm5, %v1077_v60, %v1081_v55  ;;  %v885_v38 = vrot.slane %v884_v13, 4  ;;  %v1103_v45 = vshll.u32 %v4488_v57, 16  ;;  %v898_v19 = vor.u32 %v897_v27, %v894_v51  ;;  %v4532_v51 = vld [vmem:[%s4332_s19 + $0x78] sm:$0xf] }
  0x38   : > { %v3825_v4 = vcombine.low %v1072_v31, %v1082_v2  ;;  %v1095_v39 = vrot.slane %v1093_v62, 5  ;;  %v901_v5 = vshll.u32 %v4456_v12, 16  ;;  %v907_v6 = vrot.slane %v905_v44, 4 }
  0x39   : > { %v890_v11 = vsel %vm4421_vm5, %v885_v38, %v889_v9  ;;  %v1105_v14 = vrot.slane %v1103_v45, 5  ;;  %v899_v15 = vrot.slane %v898_v19, 4  ;;  %v911_v16 = vshll.u32 %v4497_v0, 16  ;;  %v4552_v9 = vld [vmem:[%s4332_s19 + $0x1c] sm:$0xf] }
  0x3a   : > { %2423 = vrot.lane.b32.xlu1 %v3825_v4, %s4283_s23  ;;  %v3817_v18 = vcombine.low %v880_v40, %v890_v11  ;;  %v1096_v20 = vsel %vm4421_vm5, %v1091_v61, %v1095_v39  ;;  %v1100_v22 = vor.u32 %v1099_v63, %v1095_v39  ;;  %v903_v23 = vrot.slane %v901_v5, 5  ;;  %v4567_v19 = vld [vmem:[%s4332_s19 + $0x88] sm:$0xf] }
  0x3b   : > { %2329 = vrot.lane.b32.xlu0 %v3802_v46, %s4280_s20  ;;  %v913_v24 = vrot.slane %v911_v16, 5  ;;  %v3665_v25 = vrot.slane %v3649_v8, 9  ;;  %v1373_v26 = vrot.slane %v4336_v1, 5  ;;  %v1376_v29 = vrot.slane %v4462_v35, 5  ;;  %v4574_v8 = vld [vmem:[%s4332_s19 + $0x24] sm:$0xf] }
  0x3c   : > { %v1101_v32 = vrot.slane %v1100_v22, 4  ;;  %v904_v33 = vsel %vm4421_vm5, %v899_v15, %v903_v23  ;;  %v908_v34 = vor.u32 %v907_v6, %v903_v23  ;;  %v3657_v36 = vrot.slane %v3641_v28, 9  ;;  %v4583_v28 = vld [vmem:[%s4332_s19 + $0x28] sm:$0xf] }
  0x3d   : > { %v1374_v37 = vsel %vm4363_vm2, %v3665_v25, %v1373_v26  ;;  %v1375_v41 = vrot.slane %v1373_v26, 4  ;;  %v1317_v42 = vrot.slane %v4343_v7, 5  ;;  %v1320_v43 = vrot.slane %v4472_v48, 5 }
  0x3e   : > { %v1106_v1 = vsel %vm4421_vm5, %v1101_v32, %v1105_v14  ;;  %v909_v35 = vrot.slane %v908_v34, 4  ;;  %v3666_v44 = vrot.slane %v3650_v17, 9  ;;  %v1380_v46 = vrot.slane %v4444_v10, 5 }
  0x3f   : > { %2407 = vrot.lane.b32.xlu0 %v3817_v18, %s4283_s23  ;;  %v3826_v49 = vcombine.low %v1096_v20, %v1106_v1  ;;  %v1377_v50 = vsel %vm4363_vm2, %v1375_v41, %v1376_v29  ;;  %v1318_v7 = vsel %vm4363_vm2, %v3657_v36, %v1317_v42  ;;  %v1319_v48 = vrot.slane %v1317_v42, 4 }
  0x40   : > { %v914_v52 = vsel %vm4421_vm5, %v909_v35, %v913_v24  ;;  %v3841_v27 = vcombine.low %v1374_v37, %v1377_v50  ;;  %v1381_v10 = vsel %vm4363_vm2, %v3666_v44, %v1380_v46  ;;  %v1382_v31 = vrot.slane %v1380_v46, 4  ;;  %v4588_v24 = vld [vmem:[%s4332_s19 + $0x80] sm:$0x1] }
  0x41   : > { %2425 = vrot.lane.b32.xlu1 %v3826_v49, %s4283_s23  ;;  %v3818_v3 = vcombine.low %v904_v33, %v914_v52  ;;  %v1321_v54 = vsel %vm4363_vm2, %v1319_v48, %v1320_v43  ;;  %v1383_v55 = vrot.slane %v4488_v57, 5  ;;  %v3658_v56 = vrot.slane %v3642_v47, 9  ;;  %v4599_v37 = vld [vmem:[%s4332_s19 + $0x20] sm:$0x1] }
  0x42   : > { %v3833_v59 = vcombine.low %v1318_v7, %v1321_v54  ;;  %v1324_v60 = vrot.slane %v4456_v12, 5  ;;  %v1327_v40 = vrot.slane %v4497_v0, 5  ;;  %v1672_v13 = vshrl.u32 %v4532_v51, 16  ;;  %v4562_v12 = vld [vmem:[%s4332_s19 + $0x84] sm:$0xf] }
  0x43   : > { %2409 = vrot.lane.b32.xlu0 %v3818_v3, %s4283_s23  ;;  %v1384_v61 = vsel %vm4363_vm2, %v1382_v31, %v1383_v55  ;;  %v1675_v57 = vshll.u32 %v4532_v51, 16  ;;  %v1685_v62 = vshrl.u32 %v4539_v53, 16  ;;  %v3857_v63 = vcombine.low %v4532_v51, %v4539_v53 }
  0x44   : > { %v3842_v0 = vcombine.low %v1381_v10, %v1384_v61  ;;  %v1325_v2 = vsel %vm4363_vm2, %v3658_v56, %v1324_v60  ;;  %v1326_v38 = vrot.slane %v1324_v60, 4  ;;  %v1674_v45 = vrot.slane %v1672_v13, 4 }
  0x45   : > { %2503 = vrot.lane.b32.xlu1 %v3841_v27, %s4284_s24  ;;  %v1677_v4 = vrot.slane %v1675_v57, 5  ;;  %v1480_v39 = vshrl.u32 %v4546_v58, 16  ;;  %v1483_v5 = vshll.u32 %v4546_v58, 16  ;;  %v1493_v6 = vshrl.u32 %v4552_v9, 16  ;;  %v4608_v27 = vld [vmem:[%s4332_s19 + $0x8c] sm:$0x1] }
  0x46   : > { %v1328_v11 = vsel %vm4363_vm2, %v1326_v38, %v1327_v40  ;;  %v3849_v14 = vcombine.low %v4546_v58, %v4552_v9  ;;  %v1696_v15 = vshrl.u32 %v4562_v12, 16  ;;  %v1699_v16 = vshll.u32 %v4562_v12, 16  ;;  %v4618_v57 = vld [vmem:[%s4332_s19 + $0x2c] sm:$0x1] }
  0x47   : > { %2487 = vrot.lane.b32.xlu0 %v3833_v59, %s4284_s24  ;;  %v3834_v18 = vcombine.low %v1325_v2, %v1328_v11  ;;  %v1482_v20 = vrot.slane %v1480_v39, 4  ;;  %v1485_v22 = vrot.slane %v1483_v5, 5  ;;  %v1709_v23 = vshrl.u32 %v4567_v19, 16 }
  0x48   : > { %v1698_v25 = vrot.slane %v1696_v15, 4  ;;  %v1701_v26 = vrot.slane %v1699_v16, 5  ;;  %v3858_v29 = vcombine.low %v4562_v12, %v4567_v19  ;;  %v1504_v17 = vshrl.u32 %v4574_v8, 16  ;;  %v3721_v16 = vld [vmem:[%s4332_s19 + $0x18] sm:$0xe] }
  0x49   : > { %2505 = vrot.lane.b32.xlu1 %v3842_v0, %s4284_s24  ;;  %v1507_v32 = vshll.u32 %v4574_v8, 16  ;;  %v1517_v33 = vshrl.u32 %v4583_v28, 16  ;;  %v3850_v34 = vcombine.low %v4574_v8, %v4583_v28  ;;  %v1678_v36 = vor.u32 %v1677_v4, %v1674_v45  ;;  %v3729_v45 = vld [vmem:[%s4332_s19 + $0x78] sm:$0xe] }
  0x4a   : > { %v1506_v41 = vrot.slane %v1504_v17, 4  ;;  %v1681_v42 = vshll.u32 %v4539_v53, 16  ;;  %v1687_v43 = vrot.slane %v1685_v62, 4  ;;  %v1691_v1 = vshll.u32 %v4588_v24, 16 }
  0x4b   : > { %2489 = vrot.lane.b32.xlu0 %v3834_v18, %s4284_s24  ;;  %v1509_v35 = vrot.slane %v1507_v32, 5  ;;  %v1679_v44 = vrot.slane %v1678_v36, 4  ;;  %v1486_v46 = vor.u32 %v1485_v22, %v1482_v20  ;;  %v1489_v47 = vshll.u32 %v4552_v9, 16 }
  0x4c   : > { %v1683_v49 = vrot.slane %v1681_v42, 5  ;;  %v1693_v50 = vrot.slane %v1691_v1, 5  ;;  %v1495_v7 = vrot.slane %v1493_v6, 4  ;;  %v1499_v48 = vshll.u32 %v4599_v37, 16  ;;  %v4642_v42 = vld [vmem:[%s4332_s19 + $0x7c] sm:$0xf] }
  0x4d   : > { %2599 = vrot.lane.b32.xlu1 %v3857_v63, %s4285_s25  ;;  %v1487_v51 = vrot.slane %v1486_v46, 4  ;;  %v1491_v52 = vrot.slane %v1489_v47, 5  ;;  %v1702_v10 = vor.u32 %v1701_v26, %v1698_v25  ;;  %v1705_v31 = vshll.u32 %v4567_v19, 16  ;;  %v221_v25 = vld [vmem:[%s4332_s19 + $0x78] sm:$0xf] }
  0x4e   : > { %v1684_v3 = vsel %vm4421_vm5, %v1679_v44, %v1683_v49  ;;  %v1688_v54 = vor.u32 %v1687_v43, %v1683_v49  ;;  %v1501_v55 = vrot.slane %v1499_v48, 5  ;;  %v1711_v56 = vrot.slane %v1709_v23, 4  ;;  %v4653_v46 = vld [vmem:[%s4332_s19 + $0x80] sm:$0x1]  ;;  %v205_v49 = vld [vmem:[%s4332_s19 + $0x18] sm:$0xf] }
  0x4f   : > { %2583 = vrot.lane.b32.xlu0 %v3849_v14, %s4285_s25  ;;  %v1492_v58 = vsel %vm4421_vm5, %v1487_v51, %v1491_v52  ;;  %v1496_v59 = vor.u32 %v1495_v7, %v1491_v52  ;;  %v1703_v60 = vrot.slane %v1702_v10, 4  ;;  %v1707_v40 = vrot.slane %v1705_v31, 5  ;;  %v4661_v51 = vld [vmem:[%s4332_s19 + $0x1c] sm:$0xf] }
  0x50   : > { %v1689_v13 = vrot.slane %v1688_v54, 4  ;;  %v1715_v61 = vshll.u32 %v4608_v27, 16  ;;  %v1510_v62 = vor.u32 %v1509_v35, %v1506_v41  ;;  %v1513_v63 = vshll.u32 %v4583_v28, 16  ;;  %v4667_v54 = vld [vmem:[%s4332_s19 + $0x20] sm:$0x1] }
  0x51   : > { %2601 = vrot.lane.b32.xlu1 %v3858_v29, %s4285_s25  ;;  %v1497_v12 = vrot.slane %v1496_v59, 4  ;;  %v1708_v0 = vsel %vm4421_vm5, %v1703_v60, %v1707_v40  ;;  %v1712_v2 = vor.u32 %v1711_v56, %v1707_v40  ;;  %v1519_v38 = vrot.slane %v1517_v33, 4 }
  0x52   : > { %v1694_v4 = vsel %vm4421_vm5, %v1689_v13, %v1693_v50  ;;  %v1717_v39 = vrot.slane %v1715_v61, 5  ;;  %v1511_v5 = vrot.slane %v1510_v62, 4  ;;  %v1515_v6 = vrot.slane %v1513_v63, 5  ;;  %v3730_v62 = vld [vmem:[%s4332_s19 + $0x84] sm:$0xe] }
  0x53   : > { %2585 = vrot.lane.b32.xlu0 %v3850_v34, %s4285_s25  ;;  %v3873_v8 = vcombine.low %v1684_v3, %v1694_v4  ;;  %v1502_v11 = vsel %vm4421_vm5, %v1497_v12, %v1501_v55  ;;  %v1713_v14 = vrot.slane %v1712_v2, 4  ;;  %v1523_v15 = vshll.u32 %v4618_v57, 16 }
  0x54   : > { %v3865_v18 = vcombine.low %v1492_v58, %v1502_v11  ;;  %v1516_v20 = vsel %vm4421_vm5, %v1511_v5, %v1515_v6  ;;  %v1520_v22 = vor.u32 %v1519_v38, %v1515_v6  ;;  %v3745_v23 = vrot.slane %v3729_v45, 9  ;;  %v3722_v5 = vld [vmem:[%s4332_s19 + $0x24] sm:$0xe] }
  0x55   : > { %2679 = vrot.lane.b32.xlu1 %v3873_v8, %s4286_s26  ;;  %v1718_v26 = vsel %vm4421_vm5, %v1713_v14, %v1717_v39  ;;  %v1525_v29 = vrot.slane %v1523_v15, 5  ;;  %v1985_v17 = vrot.slane %v4539_v53, 5  ;;  %v1988_v32 = vrot.slane %v4588_v24, 5 }
  0x56   : > { %v3874_v33 = vcombine.low %v1708_v0, %v1718_v26  ;;  %v1521_v34 = vrot.slane %v1520_v22, 4  ;;  %v3737_v36 = vrot.slane %v3721_v16, 9  ;;  %v1929_v41 = vrot.slane %v4552_v9, 5  ;;  %v223_v22 = vld [vmem:[%s4332_s19 + $0x84] sm:$0xf] }
  0x57   : > { %2663 = vrot.lane.b32.xlu0 %v3865_v18, %s4286_s26  ;;  %v1986_v43 = vsel %vm4363_vm2, %v3745_v23, %v1985_v17  ;;  %v1987_v1 = vrot.slane %v1985_v17, 4  ;;  %v1932_v35 = vrot.slane %v4599_v37, 5  ;;  %v493_v53 = vshrl.u32 %v221_v25, 16 }
  0x58   : > { %v1526_v24 = vsel %vm4421_vm5, %v1521_v34, %v1525_v29  ;;  %v1930_v44 = vsel %vm4363_vm2, %v3737_v36, %v1929_v41  ;;  %v1931_v9 = vrot.slane %v1929_v41, 4  ;;  %v496_v47 = vshll.u32 %v221_v25, 16  ;;  %v4690_v34 = vld [vmem:[%s4332_s19 + $0x88] sm:$0xf] }
  0x59   : > { %2681 = vrot.lane.b32.xlu1 %v3874_v33, %s4286_s26  ;;  %v3866_v50 = vcombine.low %v1516_v20, %v1526_v24  ;;  %v1989_v7 = vsel %vm4363_vm2, %v1987_v1, %v1988_v32  ;;  %v495_v37 = vrot.slane %v493_v53, 4  ;;  %v502_v48 = vshll.u32 %v4642_v42, 16  ;;  %v207_v24 = vld [vmem:[%s4332_s19 + $0x24] sm:$0xf] }
  0x5a   : > { %v3889_v52 = vcombine.low %v1986_v43, %v1989_v7  ;;  %v1933_v10 = vsel %vm4363_vm2, %v1931_v9, %v1932_v35  ;;  %v498_v31 = vrot.slane %v496_v47, 5  ;;  %v506_v3 = vshrl.u32 %v4642_v42, 16  ;;  %v4695_v43 = vld [vmem:[%s4332_s19 + $0x8c] sm:$0x1] }
  0x5b   : > { %2665 = vrot.lane.b32.xlu0 %v3866_v50, %s4286_s26  ;;  %v3881_v55 = vcombine.low %v1930_v44, %v1933_v10  ;;  %v504_v56 = vrot.slane %v502_v48, 5  ;;  %v512_v58 = vshll.u32 %v4653_v46, 16  ;;  %v301_v59 = vshrl.u32 %v205_v49, 16  ;;  %v4707_v50 = vld [vmem:[%s4332_s19 + $0x28] sm:$0xf] }
  0x5c   : > { %v499_v60 = vor.u32 %v498_v31, %v495_v37  ;;  %v508_v40 = vrot.slane %v506_v3, 4  ;;  %v304_v13 = vshll.u32 %v205_v49, 16  ;;  %v310_v61 = vshll.u32 %v4661_v51, 16  ;;  %v4714_v10 = vld [vmem:[%s4332_s19 + $0x2c] sm:$0x1] }
  0x5d   : > { %2759 = vrot.lane.b32.xlu1 %v3889_v52, %s4287_s27  ;;  %v514_v63 = vrot.slane %v512_v58, 5  ;;  %v303_v12 = vrot.slane %v301_v59, 4  ;;  %v314_v0 = vshrl.u32 %v4661_v51, 16  ;;  %v320_v2 = vshll.u32 %v4667_v54, 16  ;;  %v646_v58 = vld [vmem:[%s4332_s19 + $0x78] sm:$0xe] }
  0x5e   : > { %v500_v38 = vrot.slane %v499_v60, 4  ;;  %v509_v45 = vor.u32 %v508_v40, %v504_v56  ;;  %v306_v4 = vrot.slane %v304_v13, 5  ;;  %v312_v39 = vrot.slane %v310_v61, 5  ;;  %v4201_v59 = vld [vmem:[%s6206_s1] sm:$0xff]  }
  0x5f   : > { %2743 = vrot.lane.b32.xlu0 %v3881_v55, %s4287_s27  ;;  %v316_v6 = vrot.slane %v314_v0, 4  ;;  %v322_v8 = vrot.slane %v320_v2, 5  ;;  %v3746_v11 = vrot.slane %v3730_v62, 9  ;;  %v1992_v14 = vrot.slane %v4567_v19, 5  ;;  %v638_v2 = vld [vmem:[%s4332_s19 + $0x18] sm:$0xe]  ;;  %4098 = vmatprep.subr.bf16.mxu0 %v4201_v59 }
  0x60   : > { %v505_v15 = vsel %vm4421_vm5, %v500_v38, %v504_v56  ;;  %v510_v16 = vrot.slane %v509_v45, 4  ;;  %v307_v18 = vor.u32 %v306_v4, %v303_v12  ;;  %v1995_v20 = vrot.slane %v4608_v27, 5  ;;  %4136 = vmatprep.subr.bf16.mxu1 %v4201_v59  ;;  %4099 = vmatpush3.bf16.msra.mxu0 %v4201_v59 }
  0x61   : > { %v317_v23 = vor.u32 %v316_v6, %v312_v39  ;;  %v1993_v25 = vsel %vm4363_vm2, %v3746_v11, %v1992_v14  ;;  %v1994_v26 = vrot.slane %v1992_v14, 4  ;;  %v3738_v29 = vrot.slane %v3722_v5, 9  ;;  %v4204_v5 = vld [vmem:[%s6206_s1 + $0x8] sm:$0xff]   ;;  %4139 = vmatpush3.bf16.msra.mxu1 %v4201_v59 }
  0x62   : > { %v515_v17 = vsel %vm4421_vm5, %v510_v16, %v514_v63  ;;  %v308_v19 = vrot.slane %v307_v18, 4  ;;  %v1936_v32 = vrot.slane %v4583_v28, 5  ;;  %v1939_v33 = vrot.slane %v4618_v57, 5  ;;  %4100 = vmatprep.subr.bf16.mxu0 %v4204_v5  ;;  %4137 = vmatprep.subr.bf16.mxu1 %v4204_v5 }
  0x63   : > { %v3779_v27 = vcombine.low %v505_v15, %v515_v17  ;;  %v318_v36 = vrot.slane %v317_v23, 4  ;;  %v1996_v41 = vsel %vm4363_vm2, %v1994_v26, %v1995_v20  ;;  %v517_v1 = vshrl.u32 %v223_v22, 16 }
  0x64   : > { %v313_v35 = vsel %vm4421_vm5, %v308_v19, %v312_v39  ;;  %v3890_v53 = vcombine.low %v1993_v25, %v1996_v41  ;;  %v1937_v28 = vsel %vm4363_vm2, %v3738_v29, %v1936_v32  ;;  %v1938_v57 = vrot.slane %v1936_v32, 4  ;;  %v639_v32 = vld [vmem:[%s4332_s19 + $0x24] sm:$0xe]  ;;  %4101 = vmatpush3.bf16.msra.mxu0 %v4204_v5 }
  0x65   : > { %2171 = vrot.lane.b32.xlu1 %v3779_v27, %s4282_s22  ;;  %v323_v44 = vsel %vm4421_vm5, %v318_v36, %v322_v8  ;;  %v519_v9 = vrot.slane %v517_v1, 4  ;;  %v520_v47 = vshll.u32 %v223_v22, 16  ;;  %v526_v49 = vshll.u32 %v4690_v34, 16  ;;  %v647_v22 = vld [vmem:[%s4332_s19 + $0x84] sm:$0xe]  ;;  %4140 = vmatpush3.bf16.msra.mxu1 %v4204_v5 }
  0x66   : > { %v3771_v7 = vcombine.low %v313_v35, %v323_v44  ;;  %v1940_v37 = vsel %vm4363_vm2, %v1938_v57, %v1939_v33  ;;  %v530_v48 = vshrl.u32 %v4690_v34, 16  ;;  %v536_v52 = vshll.u32 %v4695_v43, 16 }
  0x67   : > { %v3882_v31 = vcombine.low %v1937_v28, %v1940_v37  ;;  %v522_v3 = vrot.slane %v520_v47, 5  ;;  %v528_v55 = vrot.slane %v526_v49, 5  ;;  %v325_v56 = vshrl.u32 %v207_v24, 16 }
  0x68   : > { %2155 = vrot.lane.b32.xlu0 %v3771_v7, %s4282_s22  ;;  %v532_v60 = vrot.slane %v530_v48, 4  ;;  %v538_v40 = vrot.slane %v536_v52, 5  ;;  %v328_v13 = vshll.u32 %v207_v24, 16  ;;  %v334_v61 = vshll.u32 %v4707_v50, 16  ;;  %v4764_v48 = vld [vmem:[%s4332_s19 + $0x24] sm:$0xf] }
  0x69   : > { %2761 = vrot.lane.b32.xlu1 %v3890_v53, %s4287_s27  ;;  %v523_v62 = vor.u32 %v522_v3, %v519_v9  ;;  %v327_v63 = vrot.slane %v325_v56, 4  ;;  %v338_v12 = vshrl.u32 %v4707_v50, 16  ;;  %v344_v0 = vshll.u32 %v4714_v10, 16  ;;  %v4757_v9 = vld [vmem:[%s4332_s19 + $0x88] sm:$0xf] }
  0x6a   : > { %v533_v38 = vor.u32 %v532_v60, %v528_v55  ;;  %v330_v45 = vrot.slane %v328_v13, 5  ;;  %v336_v4 = vrot.slane %v334_v61, 5  ;;  %v3587_v39 = vrot.slane %v646_v58, 9  ;;  %v4775_v56 = vld [vmem:[%s4332_s19 + $0x28] sm:$0xf] }
  0x6b   : > { %v524_v6 = vrot.slane %v523_v62, 4  ;;  %v340_v8 = vrot.slane %v338_v12, 4  ;;  %v346_v11 = vrot.slane %v344_v0, 5  ;;  %v775_v14 = vrot.slane %v4642_v42, 5  ;;  %v3615_v13 = vld [vmem:[%s4332_s19 + $0x90] sm:$0xf] }
  0x6c   : > { %2745 = vrot.lane.b32.xlu0 %v3882_v31, %s4287_s27  ;;  %v534_v15 = vrot.slane %v533_v38, 4  ;;  %v331_v16 = vor.u32 %v330_v45, %v327_v63  ;;  %v778_v18 = vrot.slane %v4653_v46, 5  ;;  %v3579_v20 = vrot.slane %v638_v2, 9  ;;  %v4785_v61 = vld [vmem:[%s4332_s19 + $0x94] sm:$0xf] }
  0x6d   : > { %v529_v23 = vsel %vm4421_vm5, %v524_v6, %v528_v55  ;;  %v341_v25 = vor.u32 %v340_v8, %v336_v4  ;;  %v776_v26 = vsel %vm4363_vm2, %v3587_v39, %v775_v14  ;;  %v777_v29 = vrot.slane %v775_v14, 4  ;;  %v4791_v2 = vld [vmem:[%s4332_s19 + $0x30] sm:$0xf]  ;;  %v4794_v38 = vld [vmem:[%s4332_s19 + $0x34] sm:$0xf] }
  0x6e   : > { %v539_v42 = vsel %vm4421_vm5, %v534_v15, %v538_v40  ;;  %v332_v17 = vrot.slane %v331_v16, 4  ;;  %v719_v19 = vrot.slane %v4661_v51, 5  ;;  %v722_v46 = vrot.slane %v4667_v54, 5  ;;  %v4749_v54 = vld [vmem:[%s4332_s19 + $0x84] sm:$0xf] }
  0x6f   : > { %v3780_v33 = vcombine.low %v529_v23, %v539_v42  ;;  %v342_v27 = vrot.slane %v341_v25, 4  ;;  %v779_v36 = vsel %vm4363_vm2, %v777_v29, %v778_v18  ;;  %v3588_v41 = vrot.slane %v647_v22, 9  ;;  %v4807_v22 = vld [vmem:[%s4332_s19 + $0x8c] sm:$0x1] }
  0x70   : > { %v337_v1 = vsel %vm4421_vm5, %v332_v17, %v336_v4  ;;  %v3795_v35 = vcombine.low %v776_v26, %v779_v36  ;;  %v720_v51 = vsel %vm4363_vm2, %v3579_v20, %v719_v19  ;;  %v721_v53 = vrot.slane %v719_v19, 4  ;;  %v4812_v42 = vld [vmem:[%s4332_s19 + $0x2c] sm:$0x1] }
  0x71   : > { %2173 = vrot.lane.b32.xlu1 %v3780_v33, %s4282_s22  ;;  %v347_v28 = vsel %vm4421_vm5, %v342_v27, %v346_v11  ;;  %v782_v57 = vrot.slane %v4690_v34, 5  ;;  %v785_v24 = vrot.slane %v4695_v43, 5  ;;  %v3580_v44 = vrot.slane %v639_v32, 9 }
  0x72   : > { %v3772_v47 = vcombine.low %v337_v1, %v347_v28  ;;  %v723_v49 = vsel %vm4363_vm2, %v721_v53, %v722_v46  ;;  %v726_v7 = vrot.slane %v4707_v50, 5  ;;  %v729_v37 = vrot.slane %v4714_v10, 5 }
  0x73   : > { %v3787_v52 = vcombine.low %v720_v51, %v723_v49  ;;  %v783_v34 = vsel %vm4363_vm2, %v3588_v41, %v782_v57  ;;  %v784_v43 = vrot.slane %v782_v57, 4  ;;  %v1108_v31 = vshrl.u32 %v4749_v54, 16 }
  0x74   : > { %2157 = vrot.lane.b32.xlu0 %v3772_v47, %s4282_s22  ;;  %v727_v3 = vsel %vm4363_vm2, %v3580_v44, %v726_v7  ;;  %v728_v50 = vrot.slane %v726_v7, 4  ;;  %v1111_v10 = vshll.u32 %v4749_v54, 16  ;;  %v1121_v55 = vshrl.u32 %v4757_v9, 16 }
  0x75   : > { %2251 = vrot.lane.b32.xlu1 %v3795_v35, %s4281_s21  ;;  %v786_v58 = vsel %vm4363_vm2, %v784_v43, %v785_v24  ;;  %v1110_v59 = vrot.slane %v1108_v31, 4  ;;  %v3811_v60 = vcombine.low %v4749_v54, %v4757_v9  ;;  %v916_v40 = vshrl.u32 %v4764_v48, 16  ;;  %v4821_v24 = vld [vmem:[%s4332_s19 + $0x98] sm:$0x1] }
  0x76   : > { %v3796_v62 = vcombine.low %v783_v34, %v786_v58  ;;  %v730_v63 = vsel %vm4363_vm2, %v728_v50, %v729_v37  ;;  %v1113_v12 = vrot.slane %v1111_v10, 5  ;;  %v919_v0 = vshll.u32 %v4764_v48, 16  ;;  %v4832_v50 = vld [vmem:[%s4332_s19 + $0x38] sm:$0x1] }
  0x77   : > { %v3788_v45 = vcombine.low %v727_v3, %v730_v63  ;;  %v918_v4 = vrot.slane %v916_v40, 4  ;;  %v929_v39 = vshrl.u32 %v4775_v56, 16  ;;  %v3803_v5 = vcombine.low %v4764_v48, %v4775_v56 }
  0x78   : > { %2235 = vrot.lane.b32.xlu0 %v3787_v52, %s4281_s21  ;;  %v921_v6 = vrot.slane %v919_v0, 5  ;;  %v1132_v8 = vshrl.u32 %v3615_v13, 16  ;;  %v1135_v11 = vshll.u32 %v3615_v13, 16  ;;  %v1145_v14 = vshrl.u32 %v4785_v61, 16 }
  0x79   : > { %2253 = vrot.lane.b32.xlu1 %v3796_v62, %s4281_s21  ;;  %v3812_v15 = vcombine.low %v3615_v13, %v4785_v61  ;;  %v940_v16 = vshrl.u32 %v4791_v2, 16  ;;  %v943_v18 = vshll.u32 %v4791_v2, 16  ;;  %v953_v20 = vshrl.u32 %v4794_v38, 16  ;;  %v3651_v13 = vld [vmem:[%s4332_s19 + $0x84] sm:$0xe] }
  0x7a   : > { %v1134_v23 = vrot.slane %v1132_v8, 4  ;;  %v1137_v25 = vrot.slane %v1135_v11, 5  ;;  %v3804_v26 = vcombine.low %v4791_v2, %v4794_v38  ;;  %v1114_v29 = vor.u32 %v1113_v12, %v1110_v59 }
  0x7b   : > { %v942_v17 = vrot.slane %v940_v16, 4  ;;  %v945_v19 = vrot.slane %v943_v18, 5  ;;  %v1117_v46 = vshll.u32 %v4757_v9, 16  ;;  %v1123_v32 = vrot.slane %v1121_v55, 4 }
  0x7c   : > { %2237 = vrot.lane.b32.xlu0 %v3788_v45, %s4281_s21  ;;  %v1115_v33 = vrot.slane %v1114_v29, 4  ;;  %v1127_v27 = vshll.u32 %v4807_v22, 16  ;;  %v922_v36 = vor.u32 %v921_v6, %v918_v4  ;;  %v925_v41 = vshll.u32 %v4775_v56, 16 }
  0x7d   : > { %2347 = vrot.lane.b32.xlu1 %v3811_v60, %s4280_s20  ;;  %v1119_v1 = vrot.slane %v1117_v46, 5  ;;  %v931_v35 = vrot.slane %v929_v39, 4  ;;  %v935_v51 = vshll.u32 %v4812_v42, 16  ;;  %v1138_v53 = vor.u32 %v1137_v25, %v1134_v23 }
  0x7e   : > { %v1129_v54 = vrot.slane %v1127_v27, 5  ;;  %v923_v28 = vrot.slane %v922_v36, 4  ;;  %v927_v57 = vrot.slane %v925_v41, 5  ;;  %v1141_v44 = vshll.u32 %v4785_v61, 16  ;;  %v4865_v41 = vld [vmem:[%s4332_s19 + $0x90] sm:$0xf] }
  0x7f   : > { %v1120_v47 = vsel %vm4421_vm5, %v1115_v33, %v1119_v1  ;;  %v1124_v49 = vor.u32 %v1123_v32, %v1119_v1  ;;  %v937_v7 = vrot.slane %v935_v51, 5  ;;  %v1139_v37 = vrot.slane %v1138_v53, 4  ;;  %v4872_v53 = vld [vmem:[%s4332_s19 + $0x94] sm:$0xf] }
  0x80   : > { %2331 = vrot.lane.b32.xlu0 %v3803_v5, %s4280_s20  ;;  %v928_v48 = vsel %vm4421_vm5, %v923_v28, %v927_v57  ;;  %v932_v52 = vor.u32 %v931_v35, %v927_v57  ;;  %v1143_v34 = vrot.slane %v1141_v44, 5  ;;  %v1147_v43 = vrot.slane %v1145_v14, 4  ;;  %v3643_v5 = vld [vmem:[%s4332_s19 + $0x24] sm:$0xe]  ;;  %v4879_v44 = vld [vmem:[%s4332_s19 + $0x30] sm:$0xf] }
  0x81   : > { %2349 = vrot.lane.b32.xlu1 %v3812_v15, %s4280_s20  ;;  %v1125_v31 = vrot.slane %v1124_v49, 4  ;;  %v1151_v3 = vshll.u32 %v4821_v24, 16  ;;  %v946_v10 = vor.u32 %v945_v19, %v942_v17  ;;  %v949_v55 = vshll.u32 %v4794_v38, 16  ;;  %v3652_v15 = vld [vmem:[%s4332_s19 + $0x90] sm:$0xe] }
  0x82   : > { %v933_v58 = vrot.slane %v932_v52, 4  ;;  %v1144_v59 = vsel %vm4421_vm5, %v1139_v37, %v1143_v34  ;;  %v1148_v60 = vor.u32 %v1147_v43, %v1143_v34  ;;  %v955_v40 = vrot.slane %v953_v20, 4  ;;  %v3644_v19 = vld [vmem:[%s4332_s19 + $0x30] sm:$0xe]  ;;  %v4886_v37 = vld [vmem:[%s4332_s19 + $0x34] sm:$0xf] }
  0x83   : > { %v1130_v62 = vsel %vm4421_vm5, %v1125_v31, %v1129_v54  ;;  %v1153_v63 = vrot.slane %v1151_v3, 5  ;;  %v947_v12 = vrot.slane %v946_v10, 4  ;;  %v951_v0 = vrot.slane %v949_v55, 5 }
  0x84   : > { %2333 = vrot.lane.b32.xlu0 %v3804_v26, %s4280_s20  ;;  %v3827_v2 = vcombine.low %v1120_v47, %v1130_v62  ;;  %v938_v45 = vsel %vm4421_vm5, %v933_v58, %v937_v7  ;;  %v1149_v4 = vrot.slane %v1148_v60, 4  ;;  %v959_v39 = vshll.u32 %v4832_v50, 16  ;;  %v4903_v58 = vld [vmem:[%s4332_s19 + $0xa0] sm:$0xf]  ;;  %v4909_v62 = vld [vmem:[%s4332_s19 + $0x3c] sm:$0xf] }
  0x85   : > { %v3819_v6 = vcombine.low %v928_v48, %v938_v45  ;;  %v952_v8 = vsel %vm4421_vm5, %v947_v12, %v951_v0  ;;  %v956_v11 = vor.u32 %v955_v40, %v951_v0  ;;  %v3667_v14 = vrot.slane %v3651_v13, 9  ;;  %v4919_v45 = vld [vmem:[%s4332_s19 + $0x40] sm:$0xf] }
  0x86   : > { %2427 = vrot.lane.b32.xlu1 %v3827_v2, %s4283_s23  ;;  %v1154_v16 = vsel %vm4421_vm5, %v1149_v4, %v1153_v63  ;;  %v961_v18 = vrot.slane %v959_v39, 5  ;;  %v1387_v20 = vrot.slane %v4757_v9, 5  ;;  %v1390_v23 = vrot.slane %v4807_v22, 5 }
  0x87   : > { %v3828_v25 = vcombine.low %v1144_v59, %v1154_v16  ;;  %v957_v26 = vrot.slane %v956_v11, 4  ;;  %v3659_v29 = vrot.slane %v3643_v5, 9  ;;  %v1331_v17 = vrot.slane %v4775_v56, 5  ;;  %v4888_v48 = vpop.permute.xlu1 %2343 }
  0x88   : > { %2411 = vrot.lane.b32.xlu0 %v3819_v6, %s4283_s23  ;;  %v1388_v46 = vsel %vm4363_vm2, %v3667_v14, %v1387_v20  ;;  %v1389_v32 = vrot.slane %v1387_v20, 4  ;;  %v1334_v33 = vrot.slane %v4812_v42, 5  ;;  %v3668_v27 = vrot.slane %v3652_v15, 9 }
  0x89   : > { %v962_v9 = vsel %vm4421_vm5, %v957_v26, %v961_v18  ;;  %v1332_v22 = vsel %vm4363_vm2, %v3659_v29, %v1331_v17  ;;  %v1333_v36 = vrot.slane %v1331_v17, 4  ;;  %v1394_v56 = vrot.slane %v4785_v61, 5  ;;  %v4925_v11 = vpop.permute.xlu0 %2327  ;;  %v4938_v17 = vld [vmem:[%s4332_s19 + $0x38] sm:$0x1] }
  0x8a   : > { %2429 = vrot.lane.b32.xlu1 %v3828_v25, %s4283_s23  ;;  %v3820_v1 = vcombine.low %v952_v8, %v962_v9  ;;  %v1391_v42 = vsel %vm4363_vm2, %v1389_v32, %v1390_v23  ;;  %v1397_v35 = vrot.slane %v4821_v24, 5  ;;  %v3660_v51 = vrot.slane %v3644_v19, 9  ;;  %v4923_v8 = vld [vmem:[%s4332_s19 + $0x98] sm:$0x1] }
  0x8b   : > { %v3843_v54 = vcombine.low %v1388_v46, %v1391_v42  ;;  %v1335_v28 = vsel %vm4363_vm2, %v1333_v36, %v1334_v33  ;;  %v1395_v61 = vsel %vm4363_vm2, %v3668_v27, %v1394_v56  ;;  %v1396_v57 = vrot.slane %v1394_v56, 4 }
  0x8c   : > { %2413 = vrot.lane.b32.xlu0 %v3820_v1, %s4283_s23  ;;  %v3835_v47 = vcombine.low %v1332_v22, %v1335_v28  ;;  %v1338_v24 = vrot.slane %v4794_v38, 5  ;;  %v1341_v49 = vrot.slane %v4832_v50, 5  ;;  %v1720_v7 = vshrl.u32 %v4865_v41, 16  ;;  %v4897_v38 = vld [vmem:[%s4332_s19 + $0x9c] sm:$0xf] }
  0x8d   : > { %v1398_v52 = vsel %vm4363_vm2, %v1396_v57, %v1397_v35  ;;  %v1723_v34 = vshll.u32 %v4865_v41, 16  ;;  %v1733_v43 = vshrl.u32 %v4872_v53, 16  ;;  %v3859_v31 = vcombine.low %v4865_v41, %v4872_v53 }
  0x8e   : > { %2507 = vrot.lane.b32.xlu1 %v3843_v54, %s4284_s24  ;;  %v3844_v3 = vcombine.low %v1395_v61, %v1398_v52  ;;  %v1339_v50 = vsel %vm4363_vm2, %v3660_v51, %v1338_v24  ;;  %v1340_v10 = vrot.slane %v1338_v24, 4  ;;  %v1722_v55 = vrot.slane %v1720_v7, 4  ;;  %v4947_v54 = vld [vmem:[%s4332_s19 + $0xa4] sm:$0x1] }
  0x8f   : > { %v1725_v59 = vrot.slane %v1723_v34, 5  ;;  %v1528_v60 = vshrl.u32 %v4879_v44, 16  ;;  %v1531_v40 = vshll.u32 %v4879_v44, 16  ;;  %v1541_v13 = vshrl.u32 %v4886_v37, 16  ;;  %v4931_v20 = vpop.permute.xlu1 %2247 }
  0x90   : > { %2491 = vrot.lane.b32.xlu0 %v3835_v47, %s4284_s24  ;;  %v1342_v63 = vsel %vm4363_vm2, %v1340_v10, %v1341_v49  ;;  %v3851_v12 = vcombine.low %v4879_v44, %v4886_v37  ;;  %v1744_v0 = vshrl.u32 %v4897_v38, 16  ;;  %v1747_v2 = vshll.u32 %v4897_v38, 16 }
  0x91   : > { %v3836_v4 = vcombine.low %v1339_v50, %v1342_v63  ;;  %v1530_v39 = vrot.slane %v1528_v60, 4  ;;  %v1533_v5 = vrot.slane %v1531_v40, 5  ;;  %v1757_v6 = vshrl.u32 %v4903_v58, 16  ;;  %v4950_v57 = vpop.permute.xlu0 %2231  ;;  %v4962_v50 = vld [vmem:[%s4332_s19 + $0x44] sm:$0x1] }
  0x92   : > { %2509 = vrot.lane.b32.xlu1 %v3844_v3, %s4284_s24  ;;  %v1746_v14 = vrot.slane %v1744_v0, 4  ;;  %v1749_v15 = vrot.slane %v1747_v2, 5  ;;  %v3860_v16 = vcombine.low %v4897_v38, %v4903_v58  ;;  %v1552_v18 = vshrl.u32 %v4909_v62, 16 }
  0x93   : > { %v1555_v23 = vshll.u32 %v4909_v62, 16  ;;  %v1565_v25 = vshrl.u32 %v4919_v45, 16  ;;  %v3852_v26 = vcombine.low %v4909_v62, %v4919_v45  ;;  %v1726_v29 = vor.u32 %v1725_v59, %v1722_v55  ;;  %v4955_v7 = vpop.permute.xlu1 %2249  ;;  %v3731_v62 = vld [vmem:[%s4332_s19 + $0x90] sm:$0xe] }
  0x94   : > { %2493 = vrot.lane.b32.xlu0 %v3836_v4, %s4284_s24  ;;  %v1554_v19 = vrot.slane %v1552_v18, 4  ;;  %v1729_v46 = vshll.u32 %v4872_v53, 16  ;;  %v1735_v32 = vrot.slane %v1733_v43, 4  ;;  %v1739_v33 = vshll.u32 %v4923_v8, 16 }
  0x95   : > { %v1557_v27 = vrot.slane %v1555_v23, 5  ;;  %v1727_v9 = vrot.slane %v1726_v29, 4  ;;  %v1534_v22 = vor.u32 %v1533_v5, %v1530_v39  ;;  %v1537_v36 = vshll.u32 %v4886_v37, 16 }
  0x96   : > { %2603 = vrot.lane.b32.xlu1 %v3859_v31, %s4285_s25  ;;  %v1731_v56 = vrot.slane %v1729_v46, 5  ;;  %v1741_v41 = vrot.slane %v1739_v33, 5  ;;  %v1543_v1 = vrot.slane %v1541_v13, 4  ;;  %v1547_v42 = vshll.u32 %v4938_v17, 16 }
  0x97   : > { %v1535_v35 = vrot.slane %v1534_v22, 4  ;;  %v1539_v51 = vrot.slane %v1537_v36, 5  ;;  %v1750_v28 = vor.u32 %v1749_v15, %v1746_v14  ;;  %v1753_v61 = vshll.u32 %v4903_v58, 16  ;;  %v3723_v14 = vld [vmem:[%s4332_s19 + $0x30] sm:$0xe]  ;;  %v4975_v15 = vpop.permute.xlu0 %2233 }
  0x98   : > { %2587 = vrot.lane.b32.xlu0 %v3851_v12, %s4285_s25  ;;  %v1732_v44 = vsel %vm4421_vm5, %v1727_v9, %v1731_v56  ;;  %v1736_v47 = vor.u32 %v1735_v32, %v1731_v56  ;;  %v1549_v24 = vrot.slane %v1547_v42, 5  ;;  %v1759_v49 = vrot.slane %v1757_v6, 4  ;;  %v4990_v56 = vld [vmem:[%s4332_s19 + $0x94] sm:$0xf] }
  0x99   : > { %v1540_v52 = vsel %vm4421_vm5, %v1535_v35, %v1539_v51  ;;  %v1544_v34 = vor.u32 %v1543_v1, %v1539_v51  ;;  %v1751_v43 = vrot.slane %v1750_v28, 4  ;;  %v1755_v31 = vrot.slane %v1753_v61, 5  ;;  %v5000_v28 = vld [vmem:[%s4332_s19 + $0x98] sm:$0x1]  ;;  %v209_v61 = vld [vmem:[%s4332_s19 + $0x30] sm:$0xf] }
  0x9a   : > { %2605 = vrot.lane.b32.xlu1 %v3860_v16, %s4285_s25  ;;  %v1737_v38 = vrot.slane %v1736_v47, 4  ;;  %v1763_v3 = vshll.u32 %v4947_v54, 16  ;;  %v1558_v10 = vor.u32 %v1557_v27, %v1554_v19  ;;  %v1561_v55 = vshll.u32 %v4919_v45, 16 }
  0x9b   : > { %v1545_v59 = vrot.slane %v1544_v34, 4  ;;  %v1756_v60 = vsel %vm4421_vm5, %v1751_v43, %v1755_v31  ;;  %v1760_v40 = vor.u32 %v1759_v49, %v1755_v31  ;;  %v1567_v13 = vrot.slane %v1565_v25, 4  ;;  %v5008_v49 = vld [vmem:[%s4332_s19 + $0x34] sm:$0xf] }
  0x9c   : > { %2589 = vrot.lane.b32.xlu0 %v3852_v26, %s4285_s25  ;;  %v1742_v63 = vsel %vm4421_vm5, %v1737_v38, %v1741_v41  ;;  %v1765_v12 = vrot.slane %v1763_v3, 5  ;;  %v1559_v0 = vrot.slane %v1558_v10, 4  ;;  %v1563_v2 = vrot.slane %v1561_v55, 5  ;;  %v225_v26 = vld [vmem:[%s4332_s19 + $0x90] sm:$0xf]  ;;  %v4980_v29 = vpop.permute.xlu1 %2153 }
  0x9d   : > { %v3875_v4 = vcombine.low %v1732_v44, %v1742_v63  ;;  %v1550_v39 = vsel %vm4421_vm5, %v1545_v59, %v1549_v24  ;;  %v1761_v5 = vrot.slane %v1760_v40, 4  ;;  %v1571_v6 = vshll.u32 %v4962_v50, 16  ;;  %v5014_v3 = vld [vmem:[%s4332_s19 + $0x38] sm:$0x1] }
  0x9e   : > { %v3867_v16 = vcombine.low %v1540_v52, %v1550_v39  ;;  %v1564_v18 = vsel %vm4421_vm5, %v1559_v0, %v1563_v2  ;;  %v1568_v23 = vor.u32 %v1567_v13, %v1563_v2  ;;  %v3747_v25 = vrot.slane %v3731_v62, 9 }
  0x9f   : > { %2683 = vrot.lane.b32.xlu1 %v3875_v4, %s4286_s26  ;;  %v1766_v19 = vsel %vm4421_vm5, %v1761_v5, %v1765_v12  ;;  %v1573_v46 = vrot.slane %v1571_v6, 5  ;;  %v1999_v32 = vrot.slane %v4872_v53, 5  ;;  %v2002_v33 = vrot.slane %v4923_v8, 5 }
  0xa0   : > { %2667 = vrot.lane.b32.xlu0 %v3867_v16, %s4286_s26  ;;  %v3876_v27 = vcombine.low %v1756_v60, %v1766_v19  ;;  %v1569_v9 = vrot.slane %v1568_v23, 4  ;;  %v3739_v22 = vrot.slane %v3723_v14, 9  ;;  %v1943_v36 = vrot.slane %v4886_v37, 5  ;;  %v2152_v52 = vpop.permute.xlu0 %2151 }
  0xa1   : > { %v2000_v41 = vsel %vm4363_vm2, %v3747_v25, %v1999_v32  ;;  %v2001_v1 = vrot.slane %v1999_v32, 4  ;;  %v1946_v42 = vrot.slane %v4938_v17, 5  ;;  %v541_v53 = vshrl.u32 %v225_v26, 16 }
  0xa2   : > { %v1574_v8 = vsel %vm4421_vm5, %v1569_v9, %v1573_v46  ;;  %v1944_v35 = vsel %vm4363_vm2, %v3739_v22, %v1943_v36  ;;  %v1945_v51 = vrot.slane %v1943_v36, 4  ;;  %v544_v37 = vshll.u32 %v225_v26, 16 }
  0xa3   : > { %2685 = vrot.lane.b32.xlu1 %v3876_v27, %s4286_s26  ;;  %v3868_v44 = vcombine.low %v1564_v18, %v1574_v8  ;;  %v2003_v47 = vsel %vm4363_vm2, %v2001_v1, %v2002_v33  ;;  %v543_v17 = vrot.slane %v541_v53, 4  ;;  %v550_v24 = vshll.u32 %v4990_v56, 16  ;;  %v3732_v18 = vld [vmem:[%s4332_s19 + $0x9c] sm:$0xe]  ;;  %v4228_v33 = vld [vmem:[%s4332_s19 + $0x4] sm:$0xf] }
  0xa4   : > { %v3891_v34 = vcombine.low %v2000_v41, %v2003_v47  ;;  %v1947_v43 = vsel %vm4363_vm2, %v1945_v51, %v1946_v42  ;;  %v546_v31 = vrot.slane %v544_v37, 5  ;;  %v554_v38 = vshrl.u32 %v4990_v56, 16  ;;  %v5016_v10 = vpop.permute.xlu1 %2169  ;;  %v4229_v27 = vld [vmem:[%s4332_s19] sm:$0xf]  ;;  %v4230_v41 = vld [vmem:[%s4332_s19 + $0x10] sm:$0xf] }
  0xa5   : > { %2669 = vrot.lane.b32.xlu0 %v3868_v44, %s4286_s26  ;;  %v3883_v55 = vcombine.low %v1944_v35, %v1947_v43  ;;  %v552_v59 = vrot.slane %v550_v24, 5  ;;  %v560_v60 = vshll.u32 %v5000_v28, 16  ;;  %v349_v40 = vshrl.u32 %v209_v61, 16  ;;  %v4231_v1 = vld [vmem:[%s4332_s19 + $0xc] sm:$0xf] }
  0xa6   : > { %v547_v13 = vor.u32 %v546_v31, %v543_v17  ;;  %v556_v62 = vrot.slane %v554_v38, 4  ;;  %v352_v63 = vshll.u32 %v209_v61, 16  ;;  %v358_v12 = vshll.u32 %v5008_v49, 16  ;;  %v3724_v8 = vld [vmem:[%s4332_s19 + $0x3c] sm:$0xe] }
  0xa7   : > { %2763 = vrot.lane.b32.xlu1 %v3891_v34, %s4287_s27  ;;  %v562_v0 = vrot.slane %v560_v60, 5  ;;  %v351_v2 = vrot.slane %v349_v40, 4  ;;  %v362_v4 = vshrl.u32 %v5008_v49, 16  ;;  %v368_v39 = vshll.u32 %v5014_v3, 16  ;;  %v227_v24 = vld [vmem:[%s4332_s19 + $0x9c] sm:$0xf] }
  0xa8   : > { %v548_v5 = vrot.slane %v547_v13, 4  ;;  %v557_v6 = vor.u32 %v556_v62, %v552_v59  ;;  %v354_v14 = vrot.slane %v352_v63, 5  ;;  %v360_v16 = vrot.slane %v358_v12, 5  ;;  %v5025_v23 = vpop.permute.xlu1 %2345  ;;  %v4232_v60 = vld [vmem:[%s4332_s19 + $0x70] sm:$0xf] }
  0xa9   : > { %2747 = vrot.lane.b32.xlu0 %v3883_v55, %s4287_s27  ;;  %v364_v25 = vrot.slane %v362_v4, 4  ;;  %v5028_v26 = vpop.permute.xlu0 %2167  ;;  %v3753_v9 = vcombine.low %v4229_v27, %v4228_v33  ;;  %v370_v36 = vrot.slane %v368_v39, 5  ;;  %v3754_v42 = vcombine.low %v4231_v1, %v4230_v41  ;;  %v4233_v40 = vld [vmem:[%s4332_s19 + $0x6c] sm:$0xf]  ;;  %v5059_v62 = vld [vmem:[%s4332_s19 + $0xa0] sm:$0xf] }
  0xaa   : > { %v553_v19 = vsel %vm4421_vm5, %v548_v5, %v552_v59  ;;  %v558_v46 = vrot.slane %v557_v6, 4  ;;  %v355_v32 = vor.u32 %v354_v14, %v351_v2  ;;  %v3748_v53 = vrot.slane %v3732_v18, 9  ;;  %v5068_v2 = vld [vmem:[%s4332_s19 + $0xa4] sm:$0x1]  ;;  %v4235_v6 = vld [vmem:[%s4332_s19 + $0x60] sm:$0xf] }
  0xab   : > { %v365_v22 = vor.u32 %v364_v25, %v360_v16  ;;  %v2006_v37 = vrot.slane %v4903_v58, 5  ;;  %v2778_v47 = vsel %vm2775_vm6, %v3753_v9, %v2152_v52  ;;  %v2009_v17 = vrot.slane %v4947_v54, 5  ;;  %v4234_v5 = vld [vmem:[%s4332_s19 + $0x64] sm:$0xf] }
  0xac   : > { %v563_v35 = vsel %vm4421_vm5, %v558_v46, %v562_v0  ;;  %v356_v51 = vrot.slane %v355_v32, 4  ;;  %v5045_v43 = vpop.permute.xlu1 %2423  ;;  %v3740_v55 = vrot.slane %v3724_v8, 9  ;;  %v1950_v52 = vrot.slane %v4919_v45, 5  ;;  %v5084_v32 = vld [vmem:[%s4332_s19 + $0x40] sm:$0xf] }
  0xad   : > { %v3781_v61 = vcombine.low %v553_v19, %v563_v35  ;;  %v366_v44 = vrot.slane %v365_v22, 4  ;;  %v5043_v34 = vpop.permute.xlu0 %2329  ;;  %v2007_v58 = vsel %vm4363_vm2, %v3748_v53, %v2006_v37  ;;  %v2008_v38 = vrot.slane %v2006_v37, 4 }
  0xae   : > { %v361_v31 = vsel %vm4421_vm5, %v356_v51, %v360_v16  ;;  %v1953_v59 = vrot.slane %v4962_v50, 5  ;;  %v3762_v13 = vcombine.low %v4233_v40, %v4232_v60  ;;  %v5063_v12 = vsel %vm2775_vm6, %v3754_v42, %v4980_v29  ;;  %v211_v16 = vld [vmem:[%s4332_s19 + $0x3c] sm:$0xf] }
  0xaf   : > { %2175 = vrot.lane.b32.xlu1 %v3781_v61, %s4282_s22  ;;  %v371_v54 = vsel %vm4421_vm5, %v366_v44, %v370_v36  ;;  %v2010_v0 = vsel %vm4363_vm2, %v2008_v38, %v2009_v17  ;;  %v565_v45 = vshrl.u32 %v227_v24, 16  ;;  %v1951_v50 = vsel %vm4363_vm2, %v3740_v55, %v1950_v52 }
  0xb0   : > { %v3773_v63 = vcombine.low %v361_v31, %v371_v54  ;;  %v3892_v4 = vcombine.low %v2007_v58, %v2010_v0  ;;  %v1952_v39 = vrot.slane %v1950_v52, 4  ;;  %v3761_v14 = vcombine.low %v4235_v6, %v4234_v5  ;;  %v640_v0 = vld [vmem:[%s4332_s19 + $0x30] sm:$0xe] }
  0xb1   : > { %v5075_v18 = vpop.permute.xlu0 %2407  ;;  %v5080_v29 = vsel %vm2824_vm7, %v2778_v47, %v4950_v57  ;;  %v567_v25 = vrot.slane %v565_v45, 4  ;;  %v568_v19 = vshll.u32 %v227_v24, 16  ;;  %v574_v46 = vshll.u32 %v5059_v62, 16  ;;  %v5094_v57 = vld [vmem:[%s4332_s19 + $0x44] sm:$0x1] }
  0xb2   : > { %2159 = vrot.lane.b32.xlu0 %v3773_v63, %s4282_s22  ;;  %v1954_v33 = vsel %vm4363_vm2, %v1952_v39, %v1953_v59  ;;  %v2805_v27 = vsel %vm2775_vm6, %v3762_v13, %v5016_v10  ;;  %v578_v9 = vshrl.u32 %v5059_v62, 16  ;;  %v584_v22 = vshll.u32 %v5068_v2, 16 }
  0xb3   : > { %2765 = vrot.lane.b32.xlu1 %v3892_v4, %s4287_s27  ;;  %v5096_v36 = vpop.permute.xlu1 %2425  ;;  %v3884_v41 = vcombine.low %v1951_v50, %v1954_v33  ;;  %v570_v1 = vrot.slane %v568_v19, 5  ;;  %v576_v42 = vrot.slane %v574_v46, 5  ;;  %v373_v53 = vshrl.u32 %v211_v16, 16 }
  0xb4   : > { %v2802_v8 = vsel %vm2775_vm6, %v3761_v14, %v5028_v26  ;;  %v580_v35 = vrot.slane %v578_v9, 4  ;;  %v376_v51 = vshll.u32 %v211_v16, 16  ;;  %v382_v10 = vshll.u32 %v5084_v32, 16  ;;  %v648_v26 = vld [vmem:[%s4332_s19 + $0x90] sm:$0xe] }
  0xb5   : > { %v5101_v37 = vpop.permute.xlu0 %2409  ;;  %v571_v61 = vor.u32 %v570_v1, %v567_v25  ;;  %v375_v44 = vrot.slane %v373_v53, 4  ;;  %v386_v47 = vshrl.u32 %v5084_v32, 16  ;;  %v392_v17 = vshll.u32 %v5094_v57, 16 }
  0xb6   : > { %2749 = vrot.lane.b32.xlu0 %v3884_v41, %s4287_s27  ;;  %v581_v24 = vor.u32 %v580_v35, %v576_v42  ;;  %v586_v31 = vrot.slane %v584_v22, 5  ;;  %v378_v58 = vrot.slane %v376_v51, 5  ;;  %v384_v38 = vrot.slane %v382_v10, 5  ;;  %v641_v35 = vld [vmem:[%s4332_s19 + $0x3c] sm:$0xe] }
  0xb7   : > { %v5107_v55 = vpop.permute.xlu1 %2503  ;;  %v2842_v54 = vsel %vm2824_vm7, %v2802_v8, %v4931_v20  ;;  %v572_v52 = vrot.slane %v571_v61, 4  ;;  %v388_v59 = vrot.slane %v386_v47, 4  ;;  %v2844_v60 = vsel %vm2824_vm7, %v2805_v27, %v4955_v7 }
  0xb8   : > { %v582_v40 = vrot.slane %v581_v24, 4  ;;  %v379_v13 = vor.u32 %v378_v58, %v375_v44  ;;  %v394_v63 = vrot.slane %v392_v17, 5  ;;  %v2877_v39 = vsel %vm2857_vm8, %v2844_v60, %v5025_v23 }
  0xb9   : > { %v5114_v45 = vpop.permute.xlu0 %2487  ;;  %v577_v4 = vsel %vm4421_vm5, %v572_v52, %v576_v42  ;;  %v389_v50 = vor.u32 %v388_v59, %v384_v38  ;;  %v3589_v20 = vrot.slane %v648_v26, 9  ;;  %v789_v7 = vrot.slane %v4990_v56, 5  ;;  %v649_v42 = vld [vmem:[%s4332_s19 + $0x9c] sm:$0xe] }
  0xba   : > { %v587_v5 = vsel %vm4421_vm5, %v582_v40, %v586_v31  ;;  %v380_v6 = vrot.slane %v379_v13, 4  ;;  %v792_v14 = vrot.slane %v5000_v28, 5  ;;  %v3581_v46 = vrot.slane %v640_v0, 9  ;;  %v5164_v31 = vld [vmem:[%s4332_s19 + $0xa0] sm:$0xf] }
  0xbb   : > { %v5124_v16 = vpop.permute.xlu1 %2505  ;;  %v3782_v25 = vcombine.low %v577_v4, %v587_v5  ;;  %v390_v19 = vrot.slane %v389_v50, 4  ;;  %v733_v33 = vrot.slane %v5008_v49, 5  ;;  %v790_v27 = vsel %vm4363_vm2, %v3589_v20, %v789_v7  ;;  %v3601_v26 = vld [vmem:[%s4332_s19 + $0x3c] sm:$0xf]  ;;  %v3619_v4 = vld [vmem:[%s4332_s19 + $0xa8] sm:$0xf] }
  0xbc   : > { %v385_v23 = vsel %vm4421_vm5, %v380_v6, %v384_v38  ;;  %v791_v9 = vrot.slane %v789_v7, 4  ;;  %v736_v56 = vrot.slane %v5014_v3, 5  ;;  %v2828_v49 = vsel %vm2824_vm7, %v5063_v12, %v4975_v15 }
  0xbd   : > { %v5132_v22 = vpop.permute.xlu0 %2489  ;;  %2177 = vrot.lane.b32.xlu1 %v3782_v25, %s4282_s22  ;;  %v395_v28 = vsel %vm4421_vm5, %v390_v19, %v394_v63  ;;  %v734_v41 = vsel %vm4363_vm2, %v3581_v46, %v733_v33  ;;  %v735_v1 = vrot.slane %v733_v33, 4  ;;  %v2861_v3 = vsel %vm2857_vm8, %v2828_v49, %v5043_v34  ;;  %v5158_v34 = vld [vmem:[%s4332_s19 + $0x9c] sm:$0xf]  ;;  %v5193_v63 = vld [vmem:[%s4332_s19 + $0x40] sm:$0xf] }
  0xbe   : > { %v3774_v53 = vcombine.low %v385_v23, %v395_v28  ;;  %v793_v8 = vsel %vm4363_vm2, %v791_v9, %v792_v14  ;;  %v2875_v12 = vsel %vm2857_vm8, %v2842_v54, %v4888_v48  ;;  %v2859_v61 = vsel %vm2857_vm8, %v5080_v29, %v4925_v11  ;;  %v5203_v25 = vld [vmem:[%s4332_s19 + $0xac] sm:$0xf]  ;;  %v3603_v19 = vld [vmem:[%s4332_s19 + $0x48] sm:$0xf] }
  0xbf   : > { %v5148_v51 = vpop.permute.xlu1 %2599  ;;  %v3797_v10 = vcombine.low %v790_v27, %v793_v8  ;;  %v737_v15 = vsel %vm4363_vm2, %v735_v1, %v736_v56  ;;  %v3590_v47 = vrot.slane %v649_v42, 9  ;;  %v796_v17 = vrot.slane %v5059_v62, 5  ;;  %v5211_v9 = vld [vmem:[%s4332_s19 + $0x4c] sm:$0xf] }
  0xc0   : > { %2161 = vrot.lane.b32.xlu0 %v3774_v53, %s4282_s22  ;;  %v3789_v44 = vcombine.low %v734_v41, %v737_v15  ;;  %v799_v24 = vrot.slane %v5068_v2, 5  ;;  %v2908_v48 = vsel %vm2890_vm9, %v2875_v12, %v5045_v43  ;;  %v3582_v11 = vrot.slane %v641_v35, 9  ;;  %v5226_v35 = vld [vmem:[%s4332_s19 + $0xa4] sm:$0x1] }
  0xc1   : > { %v5166_v58 = vpop.permute.xlu0 %2583  ;;  %2255 = vrot.lane.b32.xlu1 %v3797_v10, %s4281_s21  ;;  %v740_v29 = vrot.slane %v5084_v32, 5  ;;  %v743_v38 = vrot.slane %v5094_v57, 5  ;;  %v2892_v62 = vsel %vm2890_vm9, %v2859_v61, %v5075_v18  ;;  %v797_v2 = vsel %vm4363_vm2, %v3590_v47, %v796_v17  ;;  %v5231_v61 = vld [vmem:[%s4332_s19 + $0x44] sm:$0x1] }
  0xc2   : > { %v798_v54 = vrot.slane %v796_v17, 4  ;;  %v1156_v52 = vshrl.u32 %v5158_v34, 16  ;;  %v2910_v57 = vsel %vm2890_vm9, %v2877_v39, %v5096_v36  ;;  %v1159_v60 = vshll.u32 %v5158_v34, 16 }
  0xc3   : > { %v5179_v59 = vpop.permute.xlu1 %2601  ;;  %v741_v43 = vsel %vm4363_vm2, %v3582_v11, %v740_v29  ;;  %v742_v32 = vrot.slane %v740_v29, 4  ;;  %v2894_v40 = vsel %vm2890_vm9, %v2861_v3, %v5101_v37  ;;  %v1169_v13 = vshrl.u32 %v5164_v31, 16 }
  0xc4   : > { %2239 = vrot.lane.b32.xlu0 %v3789_v44, %s4281_s21  ;;  %v800_v18 = vsel %vm4363_vm2, %v798_v54, %v799_v24  ;;  %v964_v0 = vshrl.u32 %v3601_v26, 16  ;;  %v1158_v20 = vrot.slane %v1156_v52, 4  ;;  %v967_v5 = vshll.u32 %v3601_v26, 16 }
  0xc5   : > { %v5196_v50 = vpop.permute.xlu0 %2585  ;;  %v3798_v36 = vcombine.low %v797_v2, %v800_v18  ;;  %v744_v39 = vsel %vm4363_vm2, %v742_v32, %v743_v38  ;;  %v1161_v7 = vrot.slane %v1159_v60, 5  ;;  %v3813_v37 = vcombine.low %v5158_v34, %v5164_v31  ;;  %v5252_v32 = vld [vmem:[%s4332_s19 + $0xb0] sm:$0x1] }
  0xc6   : > { %v3790_v6 = vcombine.low %v741_v43, %v744_v39  ;;  %v966_v14 = vrot.slane %v964_v0, 4  ;;  %v977_v33 = vshrl.u32 %v5193_v63, 16  ;;  %v1180_v23 = vshrl.u32 %v3619_v4, 16 }
  0xc7   : > { %v5206_v46 = vpop.permute.xlu1 %2679  ;;  %2257 = vrot.lane.b32.xlu1 %v3798_v36, %s4281_s21  ;;  %v1183_v27 = vshll.u32 %v3619_v4, 16  ;;  %v969_v56 = vrot.slane %v967_v5, 5  ;;  %v3805_v28 = vcombine.low %v3601_v26, %v5193_v63  ;;  %v2941_v49 = vsel %vm2923_vm10, %v2908_v48, %v5107_v55 }
  0xc8   : > { %2241 = vrot.lane.b32.xlu0 %v3790_v6, %s4281_s21  ;;  %v5219_v41 = vsel %vm2923_vm10, %v2892_v62, %v5114_v45  ;;  %v1182_v42 = vrot.slane %v1180_v23, 4  ;;  %v1193_v3 = vshrl.u32 %v5203_v25, 16  ;;  %v3814_v8 = vcombine.low %v3619_v4, %v5203_v25 }
  0xc9   : > { %v5221_v1 = vpop.permute.xlu0 %2663  ;;  %v1185_v53 = vrot.slane %v1183_v27, 5  ;;  %v988_v10 = vshrl.u32 %v3603_v19, 16  ;;  %v991_v15 = vshll.u32 %v3603_v19, 16  ;;  %v1001_v12 = vshrl.u32 %v5211_v9, 16 }
  0xca   : > { %v3806_v55 = vcombine.low %v3603_v19, %v5211_v9  ;;  %v5238_v34 = vsel %vm2923_vm10, %v2910_v57, %v5124_v16  ;;  %v5242_v44 = vsel %vm2923_vm10, %v2894_v40, %v5132_v22  ;;  %v1162_v47 = vor.u32 %v1161_v7, %v1158_v20 }
  0xcb   : > { %v5233_v45 = vpop.permute.xlu1 %2681  ;;  %2351 = vrot.lane.b32.xlu1 %v3813_v37, %s4280_s20  ;;  %v1165_v17 = vshll.u32 %v5164_v31, 16  ;;  %v1171_v24 = vrot.slane %v1169_v13, 4  ;;  %v1175_v48 = vshll.u32 %v5226_v35, 16  ;;  %v970_v11 = vor.u32 %v969_v56, %v966_v14  ;;  %v5265_v14 = vld [vmem:[%s4332_s19 + $0x50] sm:$0x1] }
  0xcc   : > { %2335 = vrot.lane.b32.xlu0 %v3805_v28, %s4280_s20  ;;  %v973_v29 = vshll.u32 %v5193_v63, 16  ;;  %v1163_v38 = vrot.slane %v1162_v47, 4  ;;  %v979_v16 = vrot.slane %v977_v33, 4  ;;  %v983_v62 = vshll.u32 %v5231_v61, 16 }
  0xcd   : > { %v1167_v26 = vrot.slane %v1165_v17, 5  ;;  %v5249_v2 = vpop.permute.xlu0 %2665  ;;  %v990_v22 = vrot.slane %v988_v10, 4  ;;  %v993_v54 = vrot.slane %v991_v15, 5  ;;  %v971_v52 = vrot.slane %v970_v11, 4  ;;  %v3653_v15 = vld [vmem:[%s4332_s19 + $0x9c] sm:$0xe] }
  0xce   : > { %v975_v43 = vrot.slane %v973_v29, 5  ;;  %v1177_v18 = vrot.slane %v1175_v48, 5  ;;  %v985_v0 = vrot.slane %v983_v62, 5  ;;  %v1186_v4 = vor.u32 %v1185_v53, %v1182_v42  ;;  %v3645_v48 = vld [vmem:[%s4332_s19 + $0x3c] sm:$0xe] }
  0xcf   : > { %2353 = vrot.lane.b32.xlu1 %v3814_v8, %s4280_s20  ;;  %v1168_v57 = vsel %vm4421_vm5, %v1163_v38, %v1167_v26  ;;  %v1172_v60 = vor.u32 %v1171_v24, %v1167_v26  ;;  %v5260_v36 = vpop.permute.xlu1 %2759  ;;  %v1189_v20 = vshll.u32 %v5203_v25, 16  ;;  %v1195_v5 = vrot.slane %v1193_v3, 4 }
  0xd0   : > { %2337 = vrot.lane.b32.xlu0 %v3806_v55, %s4280_s20  ;;  %v976_v40 = vsel %vm4421_vm5, %v971_v52, %v975_v43  ;;  %v980_v13 = vor.u32 %v979_v16, %v975_v43  ;;  %v1199_v6 = vshll.u32 %v5252_v32, 16  ;;  %v1187_v37 = vrot.slane %v1186_v4, 4  ;;  %v3654_v52 = vld [vmem:[%s4332_s19 + $0xa8] sm:$0xe] }
  0xd1   : > { %v1173_v39 = vrot.slane %v1172_v60, 4  ;;  %v994_v19 = vor.u32 %v993_v54, %v990_v22  ;;  %v997_v33 = vshll.u32 %v5211_v9, 16  ;;  %v2974_v27 = vsel %vm2956_vm11, %v2941_v49, %v5148_v51  ;;  %v5272_v42 = vpop.permute.xlu0 %2743 }
  0xd2   : > { %v981_v7 = vrot.slane %v980_v13, 4  ;;  %v1191_v56 = vrot.slane %v1189_v20, 5  ;;  %v1003_v28 = vrot.slane %v1001_v12, 4  ;;  %v1201_v17 = vrot.slane %v1199_v6, 5 }
  0xd3   : > { %v1178_v23 = vsel %vm4421_vm5, %v1173_v39, %v1177_v18  ;;  %v995_v8 = vrot.slane %v994_v19, 4  ;;  %v999_v10 = vrot.slane %v997_v33, 5  ;;  %v1007_v24 = vshll.u32 %v5265_v14, 16 }
  0xd4   : > { %v3829_v53 = vcombine.low %v1168_v57, %v1178_v23  ;;  %v986_v3 = vsel %vm4421_vm5, %v981_v7, %v985_v0  ;;  %v1196_v47 = vor.u32 %v1195_v5, %v1191_v56  ;;  %v2958_v51 = vsel %vm2956_vm11, %v5219_v41, %v5166_v58  ;;  %v3646_v0 = vld [vmem:[%s4332_s19 + $0x48] sm:$0xe] }
  0xd5   : > { %v3821_v55 = vcombine.low %v976_v40, %v986_v3  ;;  %v1192_v49 = vsel %vm4421_vm5, %v1187_v37, %v1191_v56  ;;  %v1000_v12 = vsel %vm4421_vm5, %v995_v8, %v999_v10  ;;  %v1004_v11 = vor.u32 %v1003_v28, %v999_v10  ;;  %v5318_v37 = vld [vmem:[%s4332_s19 + $0xa8] sm:$0xf] }
  0xd6   : > { %2431 = vrot.lane.b32.xlu1 %v3829_v53, %s4283_s23  ;;  %v1197_v38 = vrot.slane %v1196_v47, 4  ;;  %v1009_v26 = vrot.slane %v1007_v24, 5  ;;  %v3669_v16 = vrot.slane %v3653_v15, 9  ;;  %v1401_v62 = vrot.slane %v5164_v31, 5  ;;  %v5332_v53 = vld [vmem:[%s4332_s19 + $0xac] sm:$0xf] }
  0xd7   : > { %v5287_v29 = vpop.permute.xlu1 %2171  ;;  %2415 = vrot.lane.b32.xlu0 %v3821_v55, %s4283_s23  ;;  %v1005_v22 = vrot.slane %v1004_v11, 4  ;;  %v1404_v58 = vrot.slane %v5226_v35, 5  ;;  %v3661_v41 = vrot.slane %v3645_v48, 9  ;;  %v1345_v54 = vrot.slane %v5193_v63, 5  ;;  %v3681_v3 = vld [vmem:[%s4332_s19 + $0x48] sm:$0xf] }
  0xd8   : > { %v1202_v43 = vsel %vm4421_vm5, %v1197_v38, %v1201_v17  ;;  %v1402_v57 = vsel %vm4363_vm2, %v3669_v16, %v1401_v62  ;;  %v1403_v60 = vrot.slane %v1401_v62, 4  ;;  %v1348_v18 = vrot.slane %v5231_v61, 5  ;;  %v5353_v15 = vld [vmem:[%s4332_s19 + $0x4c] sm:$0xf]  ;;  %v5356_v55 = vld [vmem:[%s4332_s19 + $0xb4] sm:$0xf] }
  0xd9   : > { %v3830_v31 = vcombine.low %v1192_v49, %v1202_v43  ;;  %v1010_v35 = vsel %vm4421_vm5, %v1005_v22, %v1009_v26  ;;  %v1346_v63 = vsel %vm4363_vm2, %v3661_v41, %v1345_v54  ;;  %v1347_v13 = vrot.slane %v1345_v54, 4  ;;  %v5370_v11 = vld [vmem:[%s4332_s19 + $0x54] sm:$0xf] }
  0xda   : > { %v5299_v40 = vpop.permute.xlu0 %2155  ;;  %v3822_v4 = vcombine.low %v1000_v12, %v1010_v35  ;;  %v1405_v39 = vsel %vm4363_vm2, %v1403_v60, %v1404_v58  ;;  %v3670_v20 = vrot.slane %v3654_v52, 9  ;;  %v2976_v61 = vsel %vm2956_vm11, %v5238_v34, %v5179_v59  ;;  %v5367_v12 = vld [vmem:[%s4332_s19 + $0xb8] sm:$0xf]  ;;  %v4209_v35 = vld [vmem:[%s6206_s1 + $0x10] ss:$0 sps:$4 sm:$0x33]  }
  0xdb   : > { %2433 = vrot.lane.b32.xlu1 %v3830_v31, %s4283_s23  ;;  %v2960_v5 = vsel %vm2956_vm11, %v5242_v44, %v5196_v50  ;;  %v3845_v6 = vcombine.low %v1402_v57, %v1405_v39  ;;  %v1349_v7 = vsel %vm4363_vm2, %v1347_v13, %v1348_v18  ;;  %v5320_v19 = vpop.permute.xlu1 %2761  ;;  %v1408_v23 = vrot.slane %v5203_v25, 5  ;;  %v5377_v58 = vld [vmem:[%s4332_s19 + $0x58] sm:$0xf]  ;;  %4142 = vmatprep.subr.msk.bf16.mxu0 %vm3115_vm15, %v4209_v35 }
  0xdc   : > { %2417 = vrot.lane.b32.xlu0 %v3822_v4, %s4283_s23  ;;  %v3837_v33 = vcombine.low %v1346_v63, %v1349_v7  ;;  %v1411_v59 = vrot.slane %v5252_v32, 5  ;;  %v3662_v34 = vrot.slane %v3646_v0, 9  ;;  %v3007_v56 = vsel %vm2989_vm12, %v2974_v27, %v5206_v46  ;;  %v5397_v4 = vld [vmem:[%s4332_s19 + $0xb0] sm:$0x1]  ;;  %4143 = vmatprep.subr.msk.bf16.mxu1 %vm3115_vm15, %v4209_v35 }
  0xdd   : > { %v2991_v50 = vsel %vm2989_vm12, %v2958_v51, %v5221_v1  ;;  %v1352_v44 = vrot.slane %v5211_v9, 5  ;;  %v1355_v28 = vrot.slane %v5265_v14, 5  ;;  %v1409_v25 = vsel %vm4363_vm2, %v3670_v20, %v1408_v23 }
  0xde   : > { %v1410_v32 = vrot.slane %v1408_v23, 4  ;;  %v1768_v8 = vshrl.u32 %v5318_v37, 16  ;;  %v1771_v46 = vshll.u32 %v5318_v37, 16  ;;  %v5339_v27 = vpop.permute.xlu0 %2745  ;;  %v5346_v14 = vsel %vm2989_vm12, %v2976_v61, %v5233_v45 }
  0xdf   : > { %2511 = vrot.lane.b32.xlu1 %v3845_v6, %s4284_s24  ;;  %v1353_v9 = vsel %vm4363_vm2, %v3662_v34, %v1352_v44  ;;  %v1354_v1 = vrot.slane %v1352_v44, 4  ;;  %v5350_v10 = vsel %vm2989_vm12, %v2960_v5, %v5249_v2  ;;  %v1781_v17 = vshrl.u32 %v5332_v53, 16  ;;  %v5426_v44 = vld [vmem:[%s4332_s19 + $0x7c] sm:$0xf] }
  0xe0   : > { %2495 = vrot.lane.b32.xlu0 %v3837_v33, %s4284_s24  ;;  %v1412_v47 = vsel %vm4363_vm2, %v1410_v32, %v1411_v59  ;;  %v3861_v45 = vcombine.low %v5318_v37, %v5332_v53  ;;  %v1576_v24 = vshrl.u32 %v3681_v3, 16  ;;  %v1770_v51 = vrot.slane %v1768_v8, 4  ;;  %v5418_v59 = vld [vmem:[%s4332_s19 + $0x50] sm:$0x1] }
  0xe1   : > { %v3846_v48 = vcombine.low %v1409_v25, %v1412_v47  ;;  %v1356_v2 = vsel %vm4363_vm2, %v1354_v1, %v1355_v28  ;;  %v1579_v49 = vshll.u32 %v3681_v3, 16  ;;  %v1773_v16 = vrot.slane %v1771_v46, 5  ;;  %v5434_v25 = vld [vmem:[%s4332_s19 + $0x1c] sm:$0xf] }
  0xe2   : > { %v3838_v26 = vcombine.low %v1353_v9, %v1356_v2  ;;  %v1589_v62 = vshrl.u32 %v5353_v15, 16  ;;  %v1792_v22 = vshrl.u32 %v5356_v55, 16  ;;  %v1578_v41 = vrot.slane %v1576_v24, 4 }
  0xe3   : > { %v5372_v38 = vpop.permute.xlu1 %2173  ;;  %2513 = vrot.lane.b32.xlu1 %v3846_v48, %s4284_s24  ;;  %v1581_v54 = vrot.slane %v1579_v49, 5  ;;  %v3853_v52 = vcombine.low %v3681_v3, %v5353_v15  ;;  %v1795_v43 = vshll.u32 %v5356_v55, 16  ;;  %v1805_v57 = vshrl.u32 %v5367_v12, 16  ;;  %v5431_v3 = vld [vmem:[%s4332_s19 + $0x18] sm:$0xf] }
  0xe4   : > { %2497 = vrot.lane.b32.xlu0 %v3838_v26, %s4284_s24  ;;  %v3862_v60 = vcombine.low %v5356_v55, %v5367_v12  ;;  %v1600_v18 = vshrl.u32 %v5370_v11, 16  ;;  %v1603_v31 = vshll.u32 %v5370_v11, 16  ;;  %v5393_v13 = vrot.slane %v1792_v22, 4 }
  0xe5   : > { %v1613_v0 = vshrl.u32 %v5377_v58, 16  ;;  %v1797_v20 = vrot.slane %v1795_v43, 5  ;;  %v3854_v61 = vcombine.low %v5370_v11, %v5377_v58  ;;  %v3024_v5 = vsel %vm3022_vm13, %v2991_v50, %v5272_v42  ;;  %v5423_v50 = vld [vmem:[%s4332_s19 + $0x78] sm:$0xf] }
  0xe6   : > { %v5391_v63 = vpop.permute.xlu0 %2157  ;;  %v3040_v6 = vsel %vm3022_vm13, %v3007_v56, %v5260_v36  ;;  %v5408_v7 = vrot.slane %v1600_v18, 4  ;;  %v5410_v37 = vrot.slane %v1603_v31, 5  ;;  %4104 = vmatprep.mubr.msk.bf16.mxu0 %vm3082_vm14, %v3024_v5  ;;  %v1774_v33 = vor.u32 %v1773_v16, %v1770_v51  ;;  %v5450_v51 = vld [vmem:[%s4332_s19 + $0xbc] sm:$0x1] }
  0xe7   : > { %v5399_v39 = vpop.permute.xlu1 %2251  ;;  %2607 = vrot.lane.b32.xlu1 %v3861_v45, %s4285_s25  ;;  %4120 = vmatprep.mubr.msk.bf16.mxu1 %vm3082_vm14, %v3040_v6  ;;  %v1777_v42 = vshll.u32 %v5332_v53, 16  ;;  %v1783_v36 = vrot.slane %v1781_v17, 4  ;;  %v1787_v23 = vshll.u32 %v5397_v4, 16  ;;  %v1582_v34 = vor.u32 %v1581_v54, %v1578_v41  ;;  %v5470_v31 = vld [vmem:[%s4332_s19 + $0x5c] sm:$0x1] }
  0xe8   : > { %2591 = vrot.lane.b32.xlu0 %v3853_v52, %s4285_s25  ;;  %v3763_v28 = vcombine.low %v5423_v50, %v5426_v44  ;;  %v3755_v32 = vcombine.low %v5431_v3, %v5434_v25  ;;  %v1775_v8 = vrot.slane %v1774_v33, 4  ;;  %v1585_v46 = vshll.u32 %v5353_v15, 16  ;;  %v3733_v6 = vld [vmem:[%s4332_s19 + $0xa8] sm:$0xe] }
  0xe9   : > { %v1779_v1 = vrot.slane %v1777_v42, 5  ;;  %v1789_v55 = vrot.slane %v1787_v23, 5  ;;  %v1583_v47 = vrot.slane %v1582_v34, 4  ;;  %v1591_v17 = vrot.slane %v1589_v62, 4  ;;  %v4241_v25 = vld [vmem:[%s4332_s19 + $0x88] sm:$0xf] }
  0xea   : > { %v5420_v56 = vpop.permute.xlu0 %2235  ;;  %v1587_v45 = vrot.slane %v1585_v46, 5  ;;  %v1595_v24 = vshll.u32 %v5418_v59, 16  ;;  %v3117_v48 = vsel %vm3115_vm15, %v4209_v35, 0  ;;  %v3042_v2 = vsel %vm3022_vm13, %v5346_v14, %v5320_v19 }
  0xeb   : > { %v5441_v9 = vpop.permute.xlu1 %2253  ;;  %2609 = vrot.lane.b32.xlu1 %v3862_v60, %s4285_s25  ;;  %v1780_v49 = vsel %vm4421_vm5, %v1775_v8, %v1779_v1  ;;  %v1784_v11 = vor.u32 %v1783_v36, %v1779_v1  ;;  %4103 = vmatpush3.bf16.msra.mxu0 %v3117_v48  ;;  %v3026_v26 = vsel %vm3022_vm13, %v5350_v10, %v5339_v27  ;;  %v1801_v16 = vshll.u32 %v5367_v12, 16 }
  0xec   : > { %2593 = vrot.lane.b32.xlu0 %v3854_v61, %s4285_s25  ;;  %v1588_v19 = vsel %vm4421_vm5, %v1583_v47, %v1587_v45  ;;  %v1592_v14 = vor.u32 %v1591_v17, %v1587_v45  ;;  %v1597_v22 = vrot.slane %v1595_v24, 5  ;;  %4141 = vmatpush3.bf16.msra.mxu1 %v3117_v48  ;;  %v1798_v41 = vor.u32 %v1797_v20, %v5393_v13  ;;  %v3725_v47 = vld [vmem:[%s4332_s19 + $0x48] sm:$0xe] }
  0xed   : > { %v1785_v52 = vrot.slane %v1784_v11, 4  ;;  %v1803_v43 = vrot.slane %v1801_v16, 5  ;;  %v1807_v27 = vrot.slane %v1805_v57, 4  ;;  %v1811_v10 = vshll.u32 %v5450_v51, 16 }
  0xee   : > { %v5459_v62 = vpop.permute.xlu0 %2237  ;;  %v1593_v60 = vrot.slane %v1592_v14, 4  ;;  %v1799_v18 = vrot.slane %v1798_v41, 4  ;;  %v1606_v35 = vor.u32 %v5410_v37, %v5408_v7  ;;  %v1609_v61 = vshll.u32 %v5377_v58, 16  ;;  %4105 = vmatmul.mubr.msk.bf16.vlgmr.msra.gmra.mrb[0].mxu0 %vm3082_vm14, %v3026_v26  ;;  %v4243_v14 = vld [vmem:[%s4332_s19 + $0x28] sm:$0xf] }
  0xef   : > { %v5464_v54 = vpop.permute.xlu1 %2347  ;;  %v1790_v13 = vsel %vm4421_vm5, %v1785_v52, %v1789_v55  ;;  %v1808_v20 = vor.u32 %v1807_v27, %v1803_v43  ;;  %v1813_v5 = vrot.slane %v1811_v10, 5  ;;  %v1615_v57 = vrot.slane %v1613_v0, 4  ;;  %4121 = vmatmul.mubr.msk.bf16.vlgmr.msra.gmra.mrb[0].mxu1 %vm3082_vm14, %v3042_v2  ;;  %v5536_v10 = vld [vmem:[%s4332_s19 + $0xb0] sm:$0x1] }
  0xf0   : > { %v3877_v42 = vcombine.low %v1780_v49, %v1790_v13  ;;  %v1598_v7 = vsel %vm4421_vm5, %v1593_v60, %v1597_v22  ;;  %v1804_v37 = vsel %vm4421_vm5, %v1799_v18, %v1803_v43  ;;  %v1607_v36 = vrot.slane %v1606_v35, 4  ;;  %v5529_v43 = vld [vmem:[%s4332_s19 + $0xac] sm:$0xf]  ;;  %v213_v35 = vld [vmem:[%s4332_s19 + $0x48] sm:$0xf] }
  0xf1   : > { %v3869_v34 = vcombine.low %v1588_v19, %v1598_v7  ;;  %v1809_v8 = vrot.slane %v1808_v20, 4  ;;  %v1611_v46 = vrot.slane %v1609_v61, 5  ;;  %v1619_v0 = vshll.u32 %v5470_v31, 16  ;;  %v4242_v19 = vld [vmem:[%s4332_s19 + $0x24] sm:$0xf] }
  0xf2   : > { %v5482_v33 = vpop.permute.xlu0 %2331  ;;  %2687 = vrot.lane.b32.xlu1 %v3877_v42, %s4286_s26  ;;  %v3749_v1 = vrot.slane %v3733_v6, 9  ;;  %v2013_v55 = vrot.slane %v5332_v53, 5  ;;  %v5499_v17 = vsel %vm2775_vm6, %v3763_v28, %v5287_v29  ;;  %v5511_v29 = vsel %vm2775_vm6, %v3755_v32, %v5299_v40  ;;  %v229_v28 = vld [vmem:[%s4332_s19 + $0xa8] sm:$0xf]  ;;  %v4240_v40 = vld [vmem:[%s4332_s19 + $0x84] sm:$0xf] }
  0xf3   : > { %v5488_v23 = vpop.permute.xlu1 %2349  ;;  %2671 = vrot.lane.b32.xlu0 %v3869_v34, %s4286_s26  ;;  %v1814_v45 = vsel %vm4421_vm5, %v1809_v8, %v1813_v5  ;;  %v1616_v24 = vor.u32 %v1615_v57, %v1611_v46  ;;  %v1621_v48 = vrot.slane %v1619_v0, 5  ;;  %v1612_v50 = vsel %vm4421_vm5, %v1607_v36, %v1611_v46  ;;  %v5546_v7 = vld [vmem:[%s4332_s19 + $0x4c] sm:$0xf]  ;;  %v5560_v46 = vld [vmem:[%s4332_s19 + $0x50] sm:$0x1] }
  0xf4   : > { %v3878_v53 = vcombine.low %v1804_v37, %v1814_v45  ;;  %v2014_v44 = vsel %vm4363_vm2, %v3749_v1, %v2013_v55  ;;  %v2015_v11 = vrot.slane %v2013_v55, 4  ;;  %v2016_v26 = vrot.slane %v5397_v4, 5 }
  0xf5   : > { %v1617_v49 = vrot.slane %v1616_v24, 4  ;;  %v3741_v16 = vrot.slane %v3725_v47, 9  ;;  %v3764_v32 = vcombine.low %v4240_v40, %v4241_v25  ;;  %v3756_v22 = vcombine.low %v4242_v19, %v4243_v14  ;;  %v3726_v14 = vld [vmem:[%s4332_s19 + $0x54] sm:$0xe] }
  0xf6   : > { %v5504_v2 = vpop.permute.xlu0 %2333  ;;  %2689 = vrot.lane.b32.xlu1 %v3878_v53, %s4286_s26  ;;  %v1957_v41 = vrot.slane %v5353_v15, 5  ;;  %v1960_v52 = vrot.slane %v5418_v59, 5  ;;  %v2017_v27 = vsel %vm4363_vm2, %v2015_v11, %v2016_v26  ;;  %v589_v60 = vshrl.u32 %v229_v28, 16  ;;  %v3734_v26 = vld [vmem:[%s4332_s19 + $0xb4] sm:$0xe] }
  0xf7   : > { %v1622_v4 = vsel %vm4421_vm5, %v1617_v49, %v1621_v48  ;;  %v592_v18 = vshll.u32 %v229_v28, 16  ;;  %v3893_v13 = vcombine.low %v2014_v44, %v2017_v27  ;;  %v598_v6 = vshll.u32 %v5529_v43, 16 }
  0xf8   : > { %v5519_v3 = vpop.permute.xlu1 %2427  ;;  %v3870_v15 = vcombine.low %v1612_v50, %v1622_v4  ;;  %v1958_v59 = vsel %vm4363_vm2, %v3741_v16, %v1957_v41  ;;  %v1959_v20 = vrot.slane %v1957_v41, 4  ;;  %v591_v5 = vrot.slane %v589_v60, 4 }
  0xf9   : > { %v594_v57 = vrot.slane %v592_v18, 5  ;;  %v602_v42 = vshrl.u32 %v5529_v43, 16  ;;  %v5553_v36 = vsel %vm2775_vm6, %v3764_v32, %v5372_v38  ;;  %v608_v8 = vshll.u32 %v5536_v10, 16 }
  0xfa   : > { %v5539_v61 = vpop.permute.xlu0 %2411  ;;  %2673 = vrot.lane.b32.xlu0 %v3870_v15, %s4286_s26  ;;  %2767 = vrot.lane.b32.xlu1 %v3893_v13, %s4287_s27  ;;  %v1961_v34 = vsel %vm4363_vm2, %v1959_v20, %v1960_v52  ;;  %v397_v0 = vshrl.u32 %v213_v35, 16  ;;  %v600_v47 = vrot.slane %v598_v6, 5  ;;  %v400_v53 = vshll.u32 %v213_v35, 16  ;;  %v5595_v15 = vld [vmem:[%s4332_s19 + $0xb4] sm:$0xf] }
  0xfb   : > { %v3885_v1 = vcombine.low %v1958_v59, %v1961_v34  ;;  %v595_v55 = vor.u32 %v594_v57, %v591_v5  ;;  %v604_v45 = vrot.slane %v602_v42, 4  ;;  %v610_v38 = vrot.slane %v608_v8, 5  ;;  %v5605_v34 = vld [vmem:[%s4332_s19 + $0xb8] sm:$0xf] }
  0xfc   : > { %v5548_v37 = vpop.permute.xlu1 %2429  ;;  %v399_v48 = vrot.slane %v397_v0, 4  ;;  %v406_v50 = vshll.u32 %v5546_v7, 16  ;;  %v410_v49 = vshrl.u32 %v5546_v7, 16  ;;  %v416_v11 = vshll.u32 %v5560_v46, 16 }
  0xfd   : > { %v596_v44 = vrot.slane %v595_v55, 4  ;;  %v605_v28 = vor.u32 %v604_v45, %v600_v47  ;;  %v5572_v40 = vsel %vm2775_vm6, %v3756_v22, %v5391_v63  ;;  %v5578_v25 = vsel %vm2824_vm7, %v5499_v17, %v5399_v39 }
  0xfe   : > { %v5562_v24 = vpop.permute.xlu0 %2413  ;;  %2751 = vrot.lane.b32.xlu0 %v3885_v1, %s4287_s27  ;;  %v402_v32 = vrot.slane %v400_v53, 5  ;;  %v408_v19 = vrot.slane %v406_v50, 5  ;;  %v5584_v41 = vsel %vm2824_vm7, %v5511_v29, %v5420_v56  ;;  %v412_v52 = vrot.slane %v410_v49, 4 }
  0xff   : > { %v601_v63 = vsel %vm4421_vm5, %v596_v44, %v600_v47  ;;  %v606_v22 = vrot.slane %v605_v28, 4  ;;  %v418_v60 = vrot.slane %v416_v11, 5  ;;  %v3750_v39 = vrot.slane %v3734_v26, 9  ;;  %v5616_v47 = vld [vmem:[%s4332_s19 + $0xbc] sm:$0x1] }
 0x100   : > { %v5568_v16 = vpop.permute.xlu1 %2507  ;;  %v403_v27 = vor.u32 %v402_v32, %v399_v48  ;;  %v2020_v17 = vrot.slane %v5367_v12, 5  ;;  %v413_v35 = vor.u32 %v412_v52, %v408_v19  ;;  %v2023_v56 = vrot.slane %v5450_v51, 5  ;;  %v5631_v26 = vld [vmem:[%s4332_s19 + $0x58] sm:$0xf] }
 0x101   : > { %v611_v18 = vsel %vm4421_vm5, %v606_v22, %v610_v38  ;;  %v3742_v29 = vrot.slane %v3726_v14, 9  ;;  %v806_v12 = vrot.slane %v5536_v10, 5  ;;  %v1964_v42 = vrot.slane %v5377_v58, 5 }
 0x102   : > { %v5588_v4 = vpop.permute.xlu0 %2491  ;;  %v3783_v59 = vcombine.low %v601_v63, %v611_v18  ;;  %v404_v20 = vrot.slane %v403_v27, 4  ;;  %v2021_v5 = vsel %vm4363_vm2, %v3750_v39, %v2020_v17  ;;  %v2022_v57 = vrot.slane %v2020_v17, 4  ;;  %v5638_v63 = vld [vmem:[%s4332_s19 + $0x5c] sm:$0x1] }
 0x103   : > { %v414_v6 = vrot.slane %v413_v35, 4  ;;  %v1967_v51 = vrot.slane %v5470_v31, 5  ;;  %v750_v1 = vrot.slane %v5560_v46, 5  ;;  %v613_v58 = vshrl.u32 %v5595_v15, 16  ;;  %v5620_v31 = vld [vmem:[%s4332_s19 + $0x54] sm:$0xf] }
 0x104   : > { %v5597_v13 = vpop.permute.xlu1 %2509  ;;  %2179 = vrot.lane.b32.xlu1 %v3783_v59, %s4282_s22  ;;  %v409_v0 = vsel %vm4421_vm5, %v404_v20, %v408_v19  ;;  %v2024_v55 = vsel %vm4363_vm2, %v2022_v57, %v2023_v56  ;;  %v1965_v48 = vsel %vm4363_vm2, %v3742_v29, %v1964_v42  ;;  %v1966_v53 = vrot.slane %v1964_v42, 4  ;;  %v650_v59 = vld [vmem:[%s4332_s19 + $0xa8] sm:$0xe] }
 0x105   : > { %v419_v45 = vsel %vm4421_vm5, %v414_v6, %v418_v60  ;;  %v3894_v38 = vcombine.low %v2021_v5, %v2024_v55  ;;  %v615_v28 = vrot.slane %v613_v58, 4  ;;  %v616_v49 = vshll.u32 %v5595_v15, 16 }
 0x106   : > { %v5607_v8 = vpop.permute.xlu0 %2493  ;;  %v3775_v44 = vcombine.low %v409_v0, %v419_v45  ;;  %v622_v11 = vshll.u32 %v5605_v34, 16  ;;  %v1968_v32 = vsel %vm4363_vm2, %v1966_v53, %v1967_v51  ;;  %v626_v19 = vshrl.u32 %v5605_v34, 16  ;;  %v642_v51 = vld [vmem:[%s4332_s19 + $0x48] sm:$0xe] }
 0x107   : > { %v632_v14 = vshll.u32 %v5616_v47, 16  ;;  %v421_v22 = vshrl.u32 %v5620_v31, 16  ;;  %v3886_v27 = vcombine.low %v1965_v48, %v1968_v32  ;;  %v618_v60 = vrot.slane %v616_v49, 5 }
 0x108   : > { %v5626_v50 = vpop.permute.xlu1 %2603  ;;  %2163 = vrot.lane.b32.xlu0 %v3775_v44, %s4282_s22  ;;  %2769 = vrot.lane.b32.xlu1 %v3894_v38, %s4287_s27  ;;  %v624_v39 = vrot.slane %v622_v11, 5  ;;  %v424_v17 = vshll.u32 %v5620_v31, 16  ;;  %v2848_v18 = vsel %vm2824_vm7, %v5553_v36, %v5441_v9  ;;  %v628_v35 = vrot.slane %v626_v19, 4 }
 0x109   : > { %v423_v56 = vrot.slane %v421_v22, 4  ;;  %v430_v29 = vshll.u32 %v5631_v26, 16  ;;  %v619_v5 = vor.u32 %v618_v60, %v615_v28  ;;  %v434_v6 = vshrl.u32 %v5631_v26, 16 }
 0x10a   : > { %v5641_v52 = vpop.permute.xlu0 %2587  ;;  %v426_v57 = vrot.slane %v424_v17, 5  ;;  %v440_v42 = vshll.u32 %v5638_v63, 16  ;;  %v2832_v0 = vsel %vm2824_vm7, %v5572_v40, %v5459_v62  ;;  %v629_v55 = vor.u32 %v628_v35, %v624_v39 }
 0x10b   : > { %v634_v9 = vrot.slane %v632_v14, 5  ;;  %v432_v36 = vrot.slane %v430_v29, 5  ;;  %v620_v58 = vrot.slane %v619_v5, 4  ;;  %v436_v38 = vrot.slane %v434_v6, 4  ;;  %v651_v14 = vld [vmem:[%s4332_s19 + $0xb4] sm:$0xe] }
 0x10c   : > { %v5651_v20 = vpop.permute.xlu1 %2605  ;;  %2753 = vrot.lane.b32.xlu0 %v3886_v27, %s4287_s27  ;;  %v427_v45 = vor.u32 %v426_v57, %v423_v56  ;;  %v442_v48 = vrot.slane %v440_v42, 5  ;;  %v630_v44 = vrot.slane %v629_v55, 4  ;;  %v3591_v28 = vrot.slane %v650_v59, 9 }
 0x10d   : > { %v803_v49 = vrot.slane %v5529_v43, 5  ;;  %v3583_v11 = vrot.slane %v642_v51, 9  ;;  %v625_v62 = vsel %vm4421_vm5, %v620_v58, %v624_v39  ;;  %v437_v32 = vor.u32 %v436_v38, %v432_v36  ;;  %v5707_v38 = vld [vmem:[%s4332_s19 + $0x54] sm:$0xf] }
 0x10e   : > { %v5660_v53 = vpop.permute.xlu0 %2589  ;;  %v428_v40 = vrot.slane %v427_v45, 4  ;;  %v747_v19 = vrot.slane %v5546_v7, 5  ;;  %v2879_v22 = vsel %vm2857_vm8, %v5578_v25, %v5464_v54  ;;  %v635_v27 = vsel %vm4421_vm5, %v630_v44, %v634_v9  ;;  %v643_v54 = vld [vmem:[%s4332_s19 + $0x54] sm:$0xe] }
 0x10f   : > { %v804_v43 = vsel %vm4363_vm2, %v3591_v28, %v803_v49  ;;  %v805_v60 = vrot.slane %v803_v49, 4  ;;  %v2863_v39 = vsel %vm2857_vm8, %v5584_v41, %v5482_v33  ;;  %v3784_v35 = vcombine.low %v625_v62, %v635_v27  ;;  %v3621_v9 = vld [vmem:[%s4332_s19 + $0xb4] sm:$0xf]  ;;  %v5729_v62 = vld [vmem:[%s4332_s19 + $0x58] sm:$0xf] }
 0x110   : > { %v433_v7 = vsel %vm4421_vm5, %v428_v40, %v432_v36  ;;  %v438_v56 = vrot.slane %v437_v32, 4  ;;  %v748_v29 = vsel %vm4363_vm2, %v3583_v11, %v747_v19  ;;  %v749_v59 = vrot.slane %v747_v19, 4  ;;  %v3623_v32 = vld [vmem:[%s4332_s19 + $0xc0] sm:$0xf] }
 0x111   : > { %v5674_v17 = vpop.permute.xlu1 %2683  ;;  %v807_v25 = vsel %vm4363_vm2, %v805_v60, %v806_v12  ;;  %v3592_v5 = vrot.slane %v651_v14, 9  ;;  %2181 = vrot.lane.b32.xlu1 %v3784_v35, %s4282_s22  ;;  %v810_v57 = vrot.slane %v5605_v34, 5  ;;  %v813_v6 = vrot.slane %v5616_v47, 5 }
 0x112   : > { %v443_v33 = vsel %vm4421_vm5, %v438_v56, %v442_v48  ;;  %v3799_v41 = vcombine.low %v804_v43, %v807_v25  ;;  %v5693_v10 = vpop.permute.xlu0 %2667  ;;  %v751_v42 = vsel %vm4363_vm2, %v749_v59, %v750_v1  ;;  %v3584_v51 = vrot.slane %v643_v54, 9 }
 0x113   : > { %v3776_v12 = vcombine.low %v433_v7, %v443_v33  ;;  %v754_v55 = vrot.slane %v5631_v26, 5  ;;  %v2881_v36 = vsel %vm2857_vm8, %v2848_v18, %v5488_v23  ;;  %v811_v58 = vsel %vm4363_vm2, %v3592_v5, %v810_v57  ;;  %v5715_v18 = vld [vmem:[%s4332_s19 + $0xb8] sm:$0xf]  ;;  %v3607_v7 = vld [vmem:[%s4332_s19 + $0x60] sm:$0xf] }
 0x114   : > { %v812_v47 = vrot.slane %v810_v57, 4  ;;  %v757_v45 = vrot.slane %v5638_v63, 5  ;;  %v2865_v46 = vsel %vm2857_vm8, %v2832_v0, %v5504_v2  ;;  %v3791_v1 = vcombine.low %v748_v29, %v751_v42  ;;  %v5752_v29 = vld [vmem:[%s4332_s19 + $0x64] sm:$0xf]  ;;  %v5765_v57 = vld [vmem:[%s4332_s19 + $0xbc] sm:$0x1] }
 0x115   : > { %2165 = vrot.lane.b32.xlu0 %v3776_v12, %s4282_s22  ;;  %v2912_v48 = vsel %vm2890_vm9, %v2879_v22, %v5519_v3  ;;  %v756_v23 = vrot.slane %v754_v55, 4  ;;  %v5717_v44 = vpop.permute.xlu1 %2685  ;;  %2259 = vrot.lane.b32.xlu1 %v3799_v41, %s4281_s21  ;;  %v755_v28 = vsel %vm4363_vm2, %v3584_v51, %v754_v55  ;;  %v1204_v49 = vshrl.u32 %v3621_v9, 16 }
 0x116   : > { %v814_v63 = vsel %vm4363_vm2, %v812_v47, %v813_v6  ;;  %v1207_v2 = vshll.u32 %v3621_v9, 16  ;;  %v2896_v0 = vsel %vm2890_vm9, %v2863_v39, %v5539_v61  ;;  %v1012_v40 = vshrl.u32 %v5707_v38, 16 }
 0x117   : > { %v3800_v3 = vcombine.low %v811_v58, %v814_v63  ;;  %v758_v11 = vsel %vm4363_vm2, %v756_v23, %v757_v45  ;;  %v2914_v19 = vsel %vm2890_vm9, %v2881_v36, %v5548_v37  ;;  %v5737_v14 = vsel %vm2890_vm9, %v2865_v46, %v5562_v24  ;;  %v5741_v27 = vpop.permute.xlu0 %2669  ;;  %v5746_v37 = vld [vmem:[%s4332_s19 + $0xc4] sm:$0xf] }
 0x118   : > { %v1217_v61 = vshrl.u32 %v5715_v18, 16  ;;  %v1015_v22 = vshll.u32 %v5707_v38, 16  ;;  %v3792_v43 = vcombine.low %v755_v28, %v758_v11  ;;  %v1206_v60 = vrot.slane %v1204_v49, 4  ;;  %v5785_v11 = vld [vmem:[%s4332_s19 + $0xc8] sm:$0x1] }
 0x119   : > { %2243 = vrot.lane.b32.xlu0 %v3791_v1, %s4281_s21  ;;  %v1209_v39 = vrot.slane %v1207_v2, 5  ;;  %v3815_v35 = vcombine.low %v3621_v9, %v5715_v18  ;;  %2261 = vrot.lane.b32.xlu1 %v3800_v3, %s4281_s21  ;;  %v1014_v24 = vrot.slane %v1012_v40, 4  ;;  %v1025_v56 = vshrl.u32 %v5729_v62, 16  ;;  %v5767_v6 = vpop.permute.xlu1 %2763  ;;  %v5772_v9 = vld [vmem:[%s4332_s19 + $0x5c] sm:$0x1] }
 0x11a   : > { %v1228_v54 = vshrl.u32 %v3623_v32, 16  ;;  %v1231_v25 = vshll.u32 %v3623_v32, 16  ;;  %v1017_v59 = vrot.slane %v1015_v22, 5  ;;  %v3807_v5 = vcombine.low %v5707_v38, %v5729_v62 }
 0x11b   : > { %v5758_v33 = vsel %vm2923_vm10, %v2912_v48, %v5568_v16  ;;  %v5762_v41 = vsel %vm2923_vm10, %v2896_v0, %v5588_v4  ;;  %v1241_v12 = vshrl.u32 %v5746_v37, 16  ;;  %v3816_v42 = vcombine.low %v3623_v32, %v5746_v37  ;;  %v5780_v1 = vpop.permute.xlu0 %2747 }
 0x11c   : > { %v1036_v51 = vshrl.u32 %v3607_v7, 16  ;;  %v1039_v55 = vshll.u32 %v3607_v7, 16  ;;  %v1230_v16 = vrot.slane %v1228_v54, 4  ;;  %v1233_v36 = vrot.slane %v1231_v25, 5 }
 0x11d   : > { %2245 = vrot.lane.b32.xlu0 %v3792_v43, %s4281_s21  ;;  %v1049_v58 = vshrl.u32 %v5752_v29, 16  ;;  %v3808_v4 = vcombine.low %v3607_v7, %v5752_v29  ;;  %2355 = vrot.lane.b32.xlu1 %v3815_v35, %s4280_s20  ;;  %v1210_v47 = vor.u32 %v1209_v39, %v1206_v60  ;;  %v1213_v45 = vshll.u32 %v5715_v18, 16 }
 0x11e   : > { %v1219_v38 = vrot.slane %v1217_v61, 4  ;;  %v1223_v46 = vshll.u32 %v5765_v57, 16  ;;  %v1018_v48 = vor.u32 %v1017_v59, %v1014_v24  ;;  %v1021_v23 = vshll.u32 %v5729_v62, 16 }
 0x11f   : > { %v1027_v63 = vrot.slane %v1025_v56, 4  ;;  %v1031_v28 = vshll.u32 %v5772_v9, 16  ;;  %v1038_v49 = vrot.slane %v1036_v51, 4  ;;  %v1041_v2 = vrot.slane %v1039_v55, 5 }
 0x120   : > { %v1211_v0 = vrot.slane %v1210_v47, 4  ;;  %v1215_v3 = vrot.slane %v1213_v45, 5  ;;  %v5790_v40 = vsel %vm2923_vm10, %v2914_v19, %v5597_v13  ;;  %v1225_v32 = vrot.slane %v1223_v46, 5 }
 0x121   : > { %2339 = vrot.lane.b32.xlu0 %v3807_v5, %s4280_s20  ;;  %v1019_v61 = vrot.slane %v1018_v48, 4  ;;  %v1023_v22 = vrot.slane %v1021_v23, 5  ;;  %v5792_v43 = vpop.permute.xlu1 %2175  ;;  %2357 = vrot.lane.b32.xlu1 %v3816_v42, %s4280_s20  ;;  %v1033_v39 = vrot.slane %v1031_v28, 5  ;;  %v1234_v35 = vor.u32 %v1233_v36, %v1230_v16  ;;  %v5800_v5 = vld [vmem:[%s4332_s19 + $0x68] sm:$0x1] }
 0x122   : > { %v1220_v60 = vor.u32 %v1219_v38, %v1215_v3  ;;  %v1237_v7 = vshll.u32 %v5746_v37, 16  ;;  %v1216_v24 = vsel %vm4421_vm5, %v1211_v0, %v1215_v3  ;;  %v1243_v54 = vrot.slane %v1241_v12, 4  ;;  %v3655_v48 = vld [vmem:[%s4332_s19 + $0xb4] sm:$0xe] }
 0x123   : > { %v1028_v56 = vor.u32 %v1027_v63, %v1023_v22  ;;  %v1247_v13 = vshll.u32 %v5785_v11, 16  ;;  %v1235_v25 = vrot.slane %v1234_v35, 4  ;;  %v1042_v51 = vor.u32 %v1041_v2, %v1038_v49  ;;  %v3647_v49 = vld [vmem:[%s4332_s19 + $0x54] sm:$0xe] }
 0x124   : > { %v1221_v19 = vrot.slane %v1220_v60, 4  ;;  %v1239_v59 = vrot.slane %v1237_v7, 5  ;;  %v5802_v42 = vpop.permute.xlu0 %2159  ;;  %v1024_v55 = vsel %vm4421_vm5, %v1019_v61, %v1023_v22  ;;  %v1045_v12 = vshll.u32 %v5752_v29, 16 }
 0x125   : > { %2341 = vrot.lane.b32.xlu0 %v3808_v4, %s4280_s20  ;;  %v1029_v16 = vrot.slane %v1028_v56, 4  ;;  %v1051_v36 = vrot.slane %v1049_v58, 4  ;;  %v1249_v38 = vrot.slane %v1247_v13, 5  ;;  %v1043_v46 = vrot.slane %v1042_v51, 4  ;;  %v5815_v2 = vpop.permute.xlu1 %2765 }
 0x126   : > { %v1226_v47 = vsel %vm4421_vm5, %v1221_v19, %v1225_v32  ;;  %v1244_v45 = vor.u32 %v1243_v54, %v1239_v59  ;;  %v1047_v28 = vrot.slane %v1045_v12, 5  ;;  %v1055_v4 = vshll.u32 %v5800_v5, 16 }
 0x127   : > { %v3831_v23 = vcombine.low %v1216_v24, %v1226_v47  ;;  %v1034_v63 = vsel %vm4421_vm5, %v1029_v16, %v1033_v39  ;;  %v2931_v58 = vsel %vm2923_vm10, %v5737_v14, %v5607_v8  ;;  %v1240_v3 = vsel %vm4421_vm5, %v1235_v25, %v1239_v59  ;;  %v3656_v24 = vld [vmem:[%s4332_s19 + $0xc0] sm:$0xe] }
 0x128   : > { %v3823_v0 = vcombine.low %v1024_v55, %v1034_v63  ;;  %v1245_v32 = vrot.slane %v1244_v45, 4  ;;  %v1048_v61 = vsel %vm4421_vm5, %v1043_v46, %v1047_v28  ;;  %v1052_v22 = vor.u32 %v1051_v36, %v1047_v28  ;;  %v5831_v56 = vpop.permute.xlu0 %2749  ;;  %v3648_v55 = vld [vmem:[%s4332_s19 + $0x60] sm:$0xe] }
 0x129   : > { %2435 = vrot.lane.b32.xlu1 %v3831_v23, %s4283_s23  ;;  %v1057_v60 = vrot.slane %v1055_v4, 5  ;;  %v3671_v39 = vrot.slane %v3655_v48, 9  ;;  %v1415_v8 = vrot.slane %v5715_v18, 5  ;;  %v1418_v14 = vrot.slane %v5765_v57, 5  ;;  %v3701_v48 = vld [vmem:[%s4332_s19 + $0xc0] sm:$0xf] }
 0x12a   : > { %2419 = vrot.lane.b32.xlu0 %v3823_v0, %s4283_s23  ;;  %v1250_v35 = vsel %vm4421_vm5, %v1245_v32, %v1249_v38  ;;  %v3663_v7 = vrot.slane %v3647_v49, 9  ;;  %v1053_v13 = vrot.slane %v1052_v22, 4  ;;  %v1359_v19 = vrot.slane %v5729_v62, 5  ;;  %v5864_v4 = vld [vmem:[%s4332_s19 + $0x60] sm:$0xf] }
 0x12b   : > { %v3832_v54 = vcombine.low %v1240_v3, %v1250_v35  ;;  %v1362_v25 = vrot.slane %v5772_v9, 5  ;;  %v2978_v59 = vsel %vm2956_vm11, %v5758_v33, %v5626_v50  ;;  %v2962_v18 = vsel %vm2956_vm11, %v5762_v41, %v5641_v52  ;;  %v5883_v22 = vld [vmem:[%s4332_s19 + $0xc4] sm:$0xf]  ;;  %v3703_v35 = vld [vmem:[%s4332_s19 + $0xcc] sm:$0xf] }
 0x12c   : > { %v1416_v57 = vsel %vm4363_vm2, %v3671_v39, %v1415_v8  ;;  %v1417_v51 = vrot.slane %v1415_v8, 4  ;;  %v1058_v62 = vsel %vm4421_vm5, %v1053_v13, %v1057_v60  ;;  %v1360_v9 = vsel %vm4363_vm2, %v3663_v7, %v1359_v19  ;;  %v5898_v7 = vld [vmem:[%s4332_s19 + $0x6c] sm:$0xf] }
 0x12d   : > { %2437 = vrot.lane.b32.xlu1 %v3832_v54, %s4283_s23  ;;  %v1361_v16 = vrot.slane %v1359_v19, 4  ;;  %v3672_v50 = vrot.slane %v3656_v24, 9  ;;  %v3824_v52 = vcombine.low %v1048_v61, %v1058_v62  ;;  %v1422_v12 = vrot.slane %v5746_v37, 5 }
 0x12e   : > { %v1419_v41 = vsel %vm4363_vm2, %v1417_v51, %v1418_v14  ;;  %v1425_v36 = vrot.slane %v5785_v11, 5  ;;  %v3664_v38 = vrot.slane %v3648_v55, 9  ;;  %v1366_v46 = vrot.slane %v5752_v29, 5  ;;  %v5917_v55 = vld [vmem:[%s4332_s19 + $0x70] sm:$0xf] }
 0x12f   : > { %v5849_v33 = vpop.permute.xlu1 %2177  ;;  %v3847_v47 = vcombine.low %v1416_v57, %v1419_v41  ;;  %v1363_v45 = vsel %vm4363_vm2, %v1361_v16, %v1362_v25  ;;  %2421 = vrot.lane.b32.xlu0 %v3824_v52, %s4283_s23  ;;  %v1423_v63 = vsel %vm4363_vm2, %v3672_v50, %v1422_v12  ;;  %v1424_v28 = vrot.slane %v1422_v12, 4  ;;  %v5906_v25 = vld [vmem:[%s4332_s19 + $0x64] sm:$0xf] }
 0x130   : > { %v3839_v23 = vcombine.low %v1360_v9, %v1363_v45  ;;  %v1369_v37 = vrot.slane %v5800_v5, 5  ;;  %v2980_v29 = vsel %vm2956_vm11, %v5790_v40, %v5651_v20  ;;  %v2964_v49 = vsel %vm2956_vm11, %v2931_v58, %v5660_v53 }
 0x131   : > { %2515 = vrot.lane.b32.xlu1 %v3847_v47, %s4284_s24  ;;  %v1367_v0 = vsel %vm4363_vm2, %v3664_v38, %v1366_v46  ;;  %v1368_v3 = vrot.slane %v1366_v46, 4  ;;  %v3011_v5 = vsel %vm2989_vm12, %v2978_v59, %v5674_v17  ;;  %v1426_v61 = vsel %vm4363_vm2, %v1424_v28, %v1425_v36 }
 0x132   : > { %v5866_v11 = vpop.permute.xlu0 %2161  ;;  %v1816_v20 = vshrl.u32 %v3701_v48, 16  ;;  %v1819_v40 = vshll.u32 %v3701_v48, 16  ;;  %v2995_v53 = vsel %vm2989_vm12, %v2962_v18, %v5693_v10  ;;  %v3848_v58 = vcombine.low %v1423_v63, %v1426_v61 }
 0x133   : > { %v5876_v32 = vpop.permute.xlu1 %2255  ;;  %v1370_v60 = vsel %vm4363_vm2, %v1368_v3, %v1369_v37  ;;  %v1624_v39 = vshrl.u32 %v5864_v4, 16  ;;  %2499 = vrot.lane.b32.xlu0 %v3839_v23, %s4284_s24  ;;  %v3013_v8 = vsel %vm2989_vm12, %v2980_v29, %v5717_v44  ;;  %v2997_v14 = vsel %vm2989_vm12, %v2964_v49, %v5741_v27  ;;  %v5911_v27 = vld [vmem:[%s4332_s19 + $0xd0] sm:$0xf] }
 0x134   : > { %v3840_v17 = vcombine.low %v1367_v0, %v1370_v60  ;;  %v1627_v10 = vshll.u32 %v5864_v4, 16  ;;  %v1818_v54 = vrot.slane %v1816_v20, 4  ;;  %v1829_v13 = vshrl.u32 %v5883_v22, 16 }
 0x135   : > { %2517 = vrot.lane.b32.xlu1 %v3848_v58, %s4284_s24  ;;  %v3863_v19 = vcombine.low %v3701_v48, %v5883_v22  ;;  %v3044_v44 = vsel %vm3022_vm13, %v3011_v5, %v5767_v6  ;;  %v1821_v59 = vrot.slane %v1819_v40, 5  ;;  %v3028_v18 = vsel %vm3022_vm13, %v2995_v53, %v5780_v1  ;;  %v5923_v6 = vld [vmem:[%s4332_s19 + $0xc8] sm:$0x1] }
 0x136   : > { %v5900_v24 = vpop.permute.xlu0 %2239  ;;  %v1840_v57 = vshrl.u32 %v3703_v35, 16  ;;  %v1843_v51 = vshll.u32 %v3703_v35, 16  ;;  %4124 = vmatprep.mubr.msk.bf16.mxu1 %vm3082_vm14, %v3044_v44  ;;  %v1626_v62 = vrot.slane %v1624_v39, 4  ;;  %v1629_v9 = vrot.slane %v1627_v10, 5  ;;  %4108 = vmatprep.mubr.msk.bf16.mxu0 %vm3082_vm14, %v3028_v18  ;;  %v5955_v10 = vld [vmem:[%s4332_s19 + $0xd4] sm:$0x1] }
 0x137   : > { %v1648_v16 = vshrl.u32 %v5898_v7, 16  ;;  %v1651_v50 = vshll.u32 %v5898_v7, 16  ;;  %2501 = vrot.lane.b32.xlu0 %v3840_v17, %s4284_s24  ;;  %v1637_v1 = vshrl.u32 %v5906_v25, 16  ;;  %v3855_v41 = vcombine.low %v5864_v4, %v5906_v25  ;;  %v5942_v4 = vld [vmem:[%s4332_s19 + $0x68] sm:$0x1] }
 0x138   : > { %v1853_v12 = vshrl.u32 %v5911_v27, 16  ;;  %v3864_v36 = vcombine.low %v3703_v35, %v5911_v27  ;;  %v1842_v45 = vrot.slane %v1840_v57, 4  ;;  %v1845_v38 = vrot.slane %v1843_v51, 5 }
 0x139   : > { %v5925_v52 = vpop.permute.xlu1 %2257  ;;  %2611 = vrot.lane.b32.xlu1 %v3863_v19, %s4285_s25  ;;  %v1661_v46 = vshrl.u32 %v5917_v55, 16  ;;  %v3856_v48 = vcombine.low %v5898_v7, %v5917_v55  ;;  %v1822_v23 = vor.u32 %v1821_v59, %v1818_v54  ;;  %v1825_v63 = vshll.u32 %v5883_v22, 16 }
 0x13a   : > { %v5933_v47 = vpop.permute.xlu0 %2241  ;;  %v1831_v28 = vrot.slane %v1829_v13, 4  ;;  %v1835_v37 = vshll.u32 %v5923_v6, 16  ;;  %v1650_v29 = vrot.slane %v1648_v16, 4  ;;  %v1653_v49 = vrot.slane %v1651_v50, 5 }
 0x13b   : > { %v1630_v0 = vor.u32 %v1629_v9, %v1626_v62  ;;  %v1633_v3 = vshll.u32 %v5906_v25, 16  ;;  %2595 = vrot.lane.b32.xlu0 %v3855_v41, %s4285_s25  ;;  %v1823_v61 = vrot.slane %v1822_v23, 4  ;;  %v1827_v20 = vrot.slane %v1825_v63, 5 }
 0x13c   : > { %v1837_v40 = vrot.slane %v1835_v37, 5  ;;  %v1639_v53 = vrot.slane %v1637_v1, 4  ;;  %v1643_v35 = vshll.u32 %v5942_v4, 16  ;;  %v3046_v17 = vsel %vm3022_vm13, %v3013_v8, %v5815_v2  ;;  %v5966_v2 = vld [vmem:[%s4332_s19 + $0x74] sm:$0x1] }
 0x13d   : > { %v5945_v5 = vpop.permute.xlu1 %2351  ;;  %2613 = vrot.lane.b32.xlu1 %v3864_v36, %s4285_s25  ;;  %v1631_v60 = vrot.slane %v1630_v0, 4  ;;  %v1635_v39 = vrot.slane %v1633_v3, 5  ;;  %v1828_v7 = vsel %vm4421_vm5, %v1823_v61, %v1827_v20  ;;  %v1832_v54 = vor.u32 %v1831_v28, %v1827_v20  ;;  %4125 = vmatmul.mubr.msk.bf16.gmra.mrb[4].mxu1 %vm3082_vm14, %v3046_v17 }
 0x13e   : > { %v5948_v58 = vpop.permute.xlu0 %2335  ;;  %v3030_v13 = vsel %vm3022_vm13, %v2997_v14, %v5831_v56  ;;  %v1846_v19 = vor.u32 %v1845_v38, %v1842_v45  ;;  %v1645_v18 = vrot.slane %v1643_v35, 5  ;;  %v1849_v57 = vshll.u32 %v5911_v27, 16 }
 0x13f   : > { %v1636_v44 = vsel %vm4421_vm5, %v1631_v60, %v1635_v39  ;;  %v1640_v59 = vor.u32 %v1639_v53, %v1635_v39  ;;  %4109 = vmatmul.mubr.msk.bf16.gmra.mrb[4].mxu0 %vm3082_vm14, %v3030_v13  ;;  %2597 = vrot.lane.b32.xlu0 %v3856_v48, %s4285_s25  ;;  %v1833_v8 = vrot.slane %v1832_v54, 4  ;;  %v1855_v56 = vrot.slane %v1853_v12, 4  ;;  %v3735_v48 = vld [vmem:[%s4332_s19 + $0xc0] sm:$0xe]  ;;  %v3736_v54 = vld [vmem:[%s4332_s19 + $0xcc] sm:$0xe] }
 0x140   : > { %v1847_v51 = vrot.slane %v1846_v19, 4  ;;  %v1859_v14 = vshll.u32 %v5955_v10, 16  ;;  %v1851_v16 = vrot.slane %v1849_v57, 5  ;;  %v1654_v50 = vor.u32 %v1653_v49, %v1650_v29  ;;  %v3727_v49 = vld [vmem:[%s4332_s19 + $0x60] sm:$0xe] }
 0x141   : > { %v5971_v62 = vpop.permute.xlu1 %2353  ;;  %v1641_v9 = vrot.slane %v1640_v59, 4  ;;  %v1657_v1 = vshll.u32 %v5917_v55, 16  ;;  %v1838_v36 = vsel %vm4421_vm5, %v1833_v8, %v1837_v40  ;;  %v1663_v45 = vrot.slane %v1661_v46, 4  ;;  %v3728_v57 = vld [vmem:[%s4332_s19 + $0x6c] sm:$0xe] }
 0x142   : > { %v5974_v41 = vpop.permute.xlu0 %2337  ;;  %v1667_v38 = vshll.u32 %v5966_v2, 16  ;;  %v3879_v12 = vcombine.low %v1828_v7, %v1838_v36  ;;  %v1856_v63 = vor.u32 %v1855_v56, %v1851_v16  ;;  %v1861_v28 = vrot.slane %v1859_v14, 5 }
 0x143   : > { %v1646_v23 = vsel %vm4421_vm5, %v1641_v9, %v1645_v18  ;;  %v1655_v0 = vrot.slane %v1654_v50, 4  ;;  %v1659_v29 = vrot.slane %v1657_v1, 5  ;;  %v1852_v3 = vsel %vm4421_vm5, %v1847_v51, %v1851_v16 }
 0x144   : > { %v3871_v37 = vcombine.low %v1636_v44, %v1646_v23  ;;  %2691 = vrot.lane.b32.xlu1 %v3879_v12, %s4286_s26  ;;  %v1857_v46 = vrot.slane %v1856_v63, 4  ;;  %v3751_v61 = vrot.slane %v3735_v48, 9  ;;  %v1669_v40 = vrot.slane %v1667_v38, 5 }
 0x145   : > { %v1664_v20 = vor.u32 %v1663_v45, %v1659_v29  ;;  %v2027_v53 = vrot.slane %v5883_v22, 5  ;;  %v2030_v60 = vrot.slane %v5923_v6, 5  ;;  %v1660_v17 = vsel %vm4421_vm5, %v1655_v0, %v1659_v29 }
 0x146   : > { %2675 = vrot.lane.b32.xlu0 %v3871_v37, %s4286_s26  ;;  %v1862_v35 = vsel %vm4421_vm5, %v1857_v46, %v1861_v28  ;;  %v3743_v7 = vrot.slane %v3727_v49, 9  ;;  %v1971_v6 = vrot.slane %v5906_v25, 5  ;;  %v1974_v18 = vrot.slane %v5942_v4, 5 }
 0x147   : > { %v3880_v19 = vcombine.low %v1852_v3, %v1862_v35  ;;  %v1665_v44 = vrot.slane %v1664_v20, 4  ;;  %v2028_v59 = vsel %vm4363_vm2, %v3751_v61, %v2027_v53  ;;  %v2029_v22 = vrot.slane %v2027_v53, 4  ;;  %v4244_v53 = vld [vmem:[%s4332_s19 + $0x90] sm:$0xf] }
 0x148   : > { %v5989_v39 = vpop.permute.xlu1 %2431  ;;  %v3752_v56 = vrot.slane %v3736_v54, 9  ;;  %v2034_v14 = vrot.slane %v5911_v27, 5  ;;  %v1972_v50 = vsel %vm4363_vm2, %v3743_v7, %v1971_v6  ;;  %v1973_v25 = vrot.slane %v1971_v6, 4  ;;  %v4246_v7 = vld [vmem:[%s4332_s19 + $0x30] sm:$0xf] }
 0x149   : > { %v5996_v13 = vpop.permute.xlu0 %2415  ;;  %2693 = vrot.lane.b32.xlu1 %v3880_v19, %s4286_s26  ;;  %v1670_v8 = vsel %vm4421_vm5, %v1665_v44, %v1669_v40  ;;  %v2031_v51 = vsel %vm4363_vm2, %v2029_v22, %v2030_v60  ;;  %v2037_v36 = vrot.slane %v5955_v10, 5  ;;  %v3744_v30 = vrot.slane %v3728_v57, 9  ;;  %v4245_v60 = vld [vmem:[%s4332_s19 + $0x94] sm:$0xf] }
 0x14a   : > { %v3872_v9 = vcombine.low %v1660_v17, %v1670_v8  ;;  %v3895_v16 = vcombine.low %v2028_v59, %v2031_v51  ;;  %v2035_v4 = vsel %vm4363_vm2, %v3752_v56, %v2034_v14  ;;  %v2036_v1 = vrot.slane %v2034_v14, 4  ;;  %v4247_v54 = vld [vmem:[%s4332_s19 + $0x34] sm:$0xf] }
 0x14b   : > { %v1975_v27 = vsel %vm4363_vm2, %v1973_v25, %v1974_v18  ;;  %v1978_v38 = vrot.slane %v5917_v55, 5  ;;  %v1981_v48 = vrot.slane %v5966_v2, 5  ;;  %v3765_v35 = vcombine.low %v4244_v53, %v4245_v60 }
 0x14c   : > { %2677 = vrot.lane.b32.xlu0 %v3872_v9, %s4286_s26  ;;  %v3887_v23 = vcombine.low %v1972_v50, %v1975_v27  ;;  %v2038_v10 = vsel %vm4363_vm2, %v2036_v1, %v2037_v36  ;;  %v3757_v19 = vcombine.low %v4246_v7, %v4247_v54  ;;  %v4249_v50 = vld [vmem:[%s4332_s19 + $0xa0] sm:$0xf]  ;;  %v4250_v36 = vld [vmem:[%s4332_s19 + $0x3c] sm:$0xf] }
 0x14d   : > { %v6014_v45 = vpop.permute.xlu1 %2433  ;;  %2771 = vrot.lane.b32.xlu1 %v3895_v16, %s4287_s27  ;;  %v3896_v63 = vcombine.low %v2035_v4, %v2038_v10  ;;  %v1979_v28 = vsel %vm4363_vm2, %v3744_v30, %v1978_v38  ;;  %v1980_v37 = vrot.slane %v1978_v38, 4  ;;  %v2814_v21 = vsel %vm2775_vm6, %v3765_v35, %v5792_v43  ;;  %v4248_v16 = vld [vmem:[%s4332_s19 + $0x9c] sm:$0xf]  ;;  %v4251_v30 = vld [vmem:[%s4332_s19 + $0x40] sm:$0xf] }
 0x14e   : > { %v6021_v12 = vpop.permute.xlu0 %2417  ;;  %v2850_v59 = vsel %vm2824_vm7, %v2814_v21, %v5876_v32  ;;  %v2790_v57 = vsel %vm2775_vm6, %v3757_v19, %v5802_v42  ;;  %v3758_v27 = vcombine.low %v4250_v36, %v4251_v30 }
 0x14f   : > { %v1982_v55 = vsel %vm4363_vm2, %v1980_v37, %v1981_v48  ;;  %v2883_v22 = vsel %vm2857_vm8, %v2850_v59, %v5945_v5  ;;  %v2834_v8 = vsel %vm2824_vm7, %v2790_v57, %v5900_v24 }
 0x150   : > { %2755 = vrot.lane.b32.xlu0 %v3887_v23, %s4287_s27  ;;  %v3888_v29 = vcombine.low %v1979_v28, %v1982_v55  ;;  %v2916_v18 = vsel %vm2890_vm9, %v2883_v22, %v5989_v39  ;;  %v2867_v32 = vsel %vm2857_vm8, %v2834_v8, %v5948_v58  ;;  %v3766_v58 = vcombine.low %v4248_v16, %v4249_v50 }
 0x151   : > { %v2512_v0 = vpop.permute.xlu1 %2511  ;;  %2773 = vrot.lane.b32.xlu1 %v3896_v63, %s4287_s27  ;;  %v2900_v39 = vsel %vm2890_vm9, %v2867_v32, %v5996_v13  ;;  %v2793_v63 = vsel %vm2775_vm6, %v3758_v27, %v5866_v11  ;;  %v4253_v32 = vld [vmem:[%s4332_s19 + $0xac] sm:$0xf]  ;;  %v3768_v16 = vcombine.low %v5595_v15, %v5605_v34  ;;  %v3760_v50 = vcombine.low %v5620_v31, %v5631_v26 }
 0x152   : > { %v2496_v2 = vpop.permute.xlu0 %2495  ;;  %v2949_v43 = vsel %vm2923_vm10, %v2916_v18, %v2512_v0  ;;  %v2817_v13 = vsel %vm2775_vm6, %v3766_v58, %v5849_v33  ;;  %v2836_v33 = vsel %vm2824_vm7, %v2793_v63, %v5933_v47 }
 0x153   : > { %v2933_v9 = vsel %vm2923_vm10, %v2900_v39, %v2496_v2  ;;  %v2852_v38 = vsel %vm2824_vm7, %v2817_v13, %v5925_v52  ;;  %v2869_v52 = vsel %vm2857_vm8, %v2836_v33, %v5974_v41  ;;  %v4255_v39 = vld [vmem:[%s4332_s19 + $0x4c] sm:$0xf]  ;;  %v6120_v33 = vld [vmem:[%s6207_s2] ss:$0 sm:$0xff] }
 0x154   : > { %2757 = vrot.lane.b32.xlu0 %v3888_v29, %s4287_s27  ;;  %v2885_v48 = vsel %vm2857_vm8, %v2852_v38, %v5971_v62 }
 0x155   : > { %v2514_v49 = vpop.permute.xlu1 %2513  ;;  %v2918_v10 = vsel %vm2890_vm9, %v2885_v48, %v6014_v45  ;;  %v2902_v45 = vsel %vm2890_vm9, %v2869_v52, %v6021_v12 }
 0x156   : > { %v2498_v3 = vpop.permute.xlu0 %2497  ;;  %v2951_v28 = vsel %vm2923_vm10, %v2918_v10, %v2514_v49 }
 0x157   : > { %v2935_v11 = vsel %vm2923_vm10, %v2902_v45, %v2498_v3 }
 0x159   : > { %v2608_v46 = vpop.permute.xlu1 %2607 }
 0x15a   : > { %v2592_v61 = vpop.permute.xlu0 %2591  ;;  %v2982_v51 = vsel %vm2956_vm11, %v2949_v43, %v2608_v46 }
 0x15b   : > { %v2966_v24 = vsel %vm2956_vm11, %v2933_v9, %v2592_v61 }
 0x15d   : > { %v2610_v20 = vpop.permute.xlu1 %2609 }
 0x15e   : > { %v2594_v40 = vpop.permute.xlu0 %2593  ;;  %v2984_v37 = vsel %vm2956_vm11, %v2951_v28, %v2610_v20 }
 0x15f   : > { %v2968_v47 = vsel %vm2956_vm11, %v2935_v11, %v2594_v40 }
 0x164   : > { %v2688_v17 = vpop.permute.xlu1 %2687 }
 0x165   : > { %v2672_v44 = vpop.permute.xlu0 %2671  ;;  %v3015_v5 = vsel %vm2989_vm12, %v2982_v51, %v2688_v17  ;;  %v4252_v51 = vld [vmem:[%s4332_s19 + $0xa8] sm:$0xf] }
 0x166   : > { %v2999_v25 = vsel %vm2989_vm12, %v2966_v24, %v2672_v44 }
 0x168   : > { %v2690_v6 = vpop.permute.xlu1 %2689 }
 0x169   : > { %v3017_v0 = vsel %vm2989_vm12, %v2984_v37, %v2690_v6 }
 0x16c   : > { %v2674_v56 = vpop.permute.xlu0 %2673  ;;  %v2768_v14 = vpop.permute.xlu1 %2767 }
 0x16d   : > { %v3048_v42 = vsel %vm3022_vm13, %v3015_v5, %v2768_v14  ;;  %v3001_v29 = vsel %vm2989_vm12, %v2968_v47, %v2674_v56  ;;  %v3767_v5 = vcombine.low %v4252_v51, %v4253_v32  ;;  %v4254_v14 = vld [vmem:[%s4332_s19 + $0x48] sm:$0xf] }
 0x16e   : > { %4128 = vmatprep.mubr.msk.bf16.mxu1 %vm3082_vm14, %v3048_v42  ;;  %v3759_v42 = vcombine.low %v4254_v14, %v4255_v39 }
 0x170   : > { %v2752_v4 = vpop.permute.xlu0 %2751 }
 0x171   : > { %v3032_v1 = vsel %vm3022_vm13, %v2999_v25, %v2752_v4 }
 0x172   : > { %4112 = vmatprep.mubr.msk.bf16.mxu0 %vm3082_vm14, %v3032_v1 }
 0x176   : > { %v2180_v23 = vpop.permute.xlu1 %2179 }
 0x177   : > { %v2820_v24 = vsel %vm2775_vm6, %v3767_v5, %v2180_v23 }
 0x17a   : > { %v2164_v62 = vpop.permute.xlu0 %2163  ;;  %v2770_v55 = vpop.permute.xlu1 %2769 }
 0x17b   : > { %v3050_v2 = vsel %vm3022_vm13, %v3017_v0, %v2770_v55  ;;  %v2796_v1 = vsel %vm2775_vm6, %v3759_v42, %v2164_v62 }
 0x17c   : > { %4129 = vmatmul.mubr.msk.bf16.gmra.mrb[8].mxu1 %vm3082_vm14, %v3050_v2 }
 0x17e   : > { %v2754_v49 = vpop.permute.xlu0 %2753 }
 0x17f   : > { %v3034_v41 = vsel %vm3022_vm13, %v3001_v29, %v2754_v49 }
 0x180   : > { %4113 = vmatmul.mubr.msk.bf16.gmra.mrb[8].mxu0 %vm3082_vm14, %v3034_v41 }
 0x183   : > { %v2182_v46 = vpop.permute.xlu1 %2181 }
 0x184   : > { %v2823_v36 = vsel %vm2775_vm6, %v3768_v16, %v2182_v46 }
 0x187   : > { %v2166_v61 = vpop.permute.xlu0 %2165  ;;  %v2260_v20 = vpop.permute.xlu1 %2259 }
 0x188   : > { %v2854_v58 = vsel %vm2824_vm7, %v2820_v24, %v2260_v20  ;;  %v2799_v15 = vsel %vm2775_vm6, %v3760_v50, %v2166_v61 }
 0x18b   : > { %v2244_v53 = vpop.permute.xlu0 %2243  ;;  %v2262_v12 = vpop.permute.xlu1 %2261 }
 0x18c   : > { %v2838_v30 = vsel %vm2824_vm7, %v2796_v1, %v2244_v53  ;;  %v2856_v34 = vsel %vm2824_vm7, %v2823_v36, %v2262_v12 }
 0x18f   : > { %v2246_v60 = vpop.permute.xlu0 %2245  ;;  %v2356_v35 = vpop.permute.xlu1 %2355 }
 0x190   : > { %v2887_v25 = vsel %vm2857_vm8, %v2854_v58, %v2356_v35  ;;  %v2840_v48 = vsel %vm2824_vm7, %v2799_v15, %v2246_v60 }
 0x193   : > { %v2340_v3 = vpop.permute.xlu0 %2339  ;;  %v2358_v17 = vpop.permute.xlu1 %2357 }
 0x194   : > { %v2871_v31 = vsel %vm2857_vm8, %v2838_v30, %v2340_v3  ;;  %v2889_v23 = vsel %vm2857_vm8, %v2856_v34, %v2358_v17 }
 0x197   : > { %v2342_v21 = vpop.permute.xlu0 %2341 }
 0x198   : > { %v2873_v37 = vsel %vm2857_vm8, %v2840_v48, %v2342_v21 }
 0x19b   : > { %v2436_v40 = vpop.permute.xlu1 %2435 }
 0x19c   : > { %v2420_v7 = vpop.permute.xlu0 %2419  ;;  %v2920_v13 = vsel %vm2890_vm9, %v2887_v25, %v2436_v40 }
 0x19d   : > { %v2904_v10 = vsel %vm2890_vm9, %v2871_v31, %v2420_v7 }
 0x19f   : > { %v2438_v54 = vpop.permute.xlu1 %2437 }
 0x1a0   : > { %v2922_v52 = vsel %vm2890_vm9, %v2889_v23, %v2438_v54 }
 0x1a1   : > { %v2422_v19 = vpop.permute.xlu0 %2421 }
 0x1a2   : > { %v2906_v45 = vsel %vm2890_vm9, %v2873_v37, %v2422_v19 }
 0x1a3   : > { %v2516_v44 = vpop.permute.xlu1 %2515 }
 0x1a4   : > { %v2953_v27 = vsel %vm2923_vm10, %v2920_v13, %v2516_v44 }
 0x1a5   : > { %v2500_v59 = vpop.permute.xlu0 %2499 }
 0x1a6   : > { %v2937_v0 = vsel %vm2923_vm10, %v2904_v10, %v2500_v59 }
 0x1a7   : > { %v2518_v22 = vpop.permute.xlu1 %2517 }
 0x1a8   : > { %v2955_v2 = vsel %vm2923_vm10, %v2922_v52, %v2518_v22 }
 0x1a9   : > { %v2502_v6 = vpop.permute.xlu0 %2501 }
 0x1aa   : > { %v2939_v12 = vsel %vm2923_vm10, %v2906_v45, %v2502_v6 }
 0x1ab   : > { %v2612_v18 = vpop.permute.xlu1 %2611 }
 0x1ac   : > { %v2986_v26 = vsel %vm2956_vm11, %v2953_v27, %v2612_v18 }
 0x1ad   : > { %v2596_v57 = vpop.permute.xlu0 %2595 }
 0x1ae   : > { %v2970_v11 = vsel %vm2956_vm11, %v2937_v0, %v2596_v57 }
 0x1af   : > { %v2614_v43 = vpop.permute.xlu1 %2613 }
 0x1b0   : > { %v2988_v49 = vsel %vm2956_vm11, %v2955_v2, %v2614_v43 }
 0x1b1   : > { %v2598_v8 = vpop.permute.xlu0 %2597 }
 0x1b2   : > { %v2972_v40 = vsel %vm2956_vm11, %v2939_v12, %v2598_v8 }
 0x1b6   : > { %v2692_v56 = vpop.permute.xlu1 %2691 }
 0x1b7   : > { %v3019_v63 = vsel %vm2989_vm12, %v2986_v26, %v2692_v56 }
 0x1b8   : > { %v2676_v9 = vpop.permute.xlu0 %2675 }
 0x1b9   : > { %v3003_v41 = vsel %vm2989_vm12, %v2970_v11, %v2676_v9 }
 0x1bb   : > { %v2694_v4 = vpop.permute.xlu1 %2693 }
 0x1bc   : > { %v3021_v60 = vsel %vm2989_vm12, %v2988_v49, %v2694_v4 }
 0x1be   : > { %v2678_v38 = vpop.permute.xlu0 %2677 }
 0x1bf   : > { %v2772_v28 = vpop.permute.xlu1 %2771  ;;  %v3005_v22 = vsel %vm2989_vm12, %v2972_v40, %v2678_v38 }
 0x1c0   : > { %v3052_v62 = vsel %vm3022_vm13, %v3019_v63, %v2772_v28 }
 0x1c1   : > { %v4106_v55 = vpop.f32.mrb[0].mxu0  ;;  %4132 = vmatprep.mubr.msk.bf16.mxu1 %vm3082_vm14, %v3052_v62 }
 0x1c2   : > { %v4122_v47 = vpop.f32.mrb[0].mxu1  ;;  %v3153_v29 = vpop.f32.mrb[1].mxu0  ;;  %v3162_v61 = vadd.f32 %v4106_v55, %v6120_v33 }
 0x1c3   : > { %v2756_v46 = vpop.permute.xlu0 %2755  ;;  %v3226_v20 = vadd.f32 %v4122_v47, %v6120_v33  ;;  %v3217_v53 = vpop.f32.mrb[1].mxu1  ;;  %v3154_v17 = vadd.f32 %v6120_v33, %v3153_v29 }
 0x1c4   : > { %v3036_v35 = vsel %vm3022_vm13, %v3003_v41, %v2756_v46  ;;  %v2774_v3 = vpop.permute.xlu1 %2773  ;;  %v4107_v21 = vpop.f32.mrb[2].mxu0  ;;  %v3218_v54 = vadd.f32 %v6120_v33, %v3217_v53  ;;  %v3282_v8 = vmax.f32 %v3162_v61, 0.0 }
 0x1c5   : > { %4116 = vmatprep.mubr.msk.bf16.mxu0 %vm3082_vm14, %v3036_v35  ;;  %v3054_v7 = vsel %vm3022_vm13, %v3021_v60, %v2774_v3  ;;  %v3165_v19 = vadd.f32 %v4107_v21, %v6120_v33  ;;  %v4123_v44 = vpop.f32.mrb[2].mxu1  ;;  %v3156_v59 = vpop.f32.mrb[3].mxu0  ;;  %v3298_v51 = vmax.f32 %v3226_v20, 0.0  ;;  %v3280_v14 = vmax.f32 %v3154_v17, 0.0 }
 0x1c6   : > { %4133 = vmatmul.mubr.msk.bf16.gmra.mrb[12].mxu1 %vm3082_vm14, %v3054_v7  ;;  %v3229_v6 = vadd.f32 %v4123_v44, %v6120_v33  ;;  %v3157_v18 = vadd.f32 %v6120_v33, %v3156_v59  ;;  %v3220_v57 = vpop.f32.mrb[3].mxu1  ;;  %v3296_v9 = vmax.f32 %v3218_v54, 0.0 }
 0x1c7   : > { %v2758_v43 = vpop.permute.xlu0 %2757  ;;  %v3283_v32 = vmax.f32 %v3165_v19, 0.0  ;;  %v3221_v5 = vadd.f32 %v6120_v33, %v3220_v57 }
 0x1c8   : > { %v3038_v56 = vsel %vm3022_vm13, %v3005_v22, %v2758_v43  ;;  %v3299_v39 = vmax.f32 %v3229_v6, 0.0  ;;  %v3281_v42 = vmax.f32 %v3157_v18, 0.0 }
 0x1c9   : > { %4117 = vmatmul.mubr.msk.bf16.gmra.mrb[12].mxu0 %vm3082_vm14, %v3038_v56  ;;  %v3992_v24 = vpack.c.bf16 %v3283_v32, %v3282_v8  ;;  %v3297_v16 = vmax.f32 %v3221_v5, 0.0 }
 0x1ca   : > { %v4032_v50 = vpack.c.bf16 %v3299_v39, %v3298_v51  ;;  %v3987_v58 = vpack.c.bf16 %v3281_v42, %v3280_v14 }
 0x1cb   : > { %4064 = vst [vmem:[%s6153_s12 + $0x8] sm:$0xff] %v3992_v24   ;;  %v4027_v25 = vpack.c.bf16 %v3297_v16, %v3296_v9 }
 0x1cc   : > { %4072 = vst [vmem:[%s6153_s12 + $0x48] sm:$0xff] %v4032_v50   ;;  %3988 = vst [vmem:[%s6153_s12] sm:$0xff] %v3987_v58  }
 0x1cd   : > { %4071 = vst [vmem:[%s6153_s12 + $0x40] sm:$0xff] %v4027_v25  }
 0x210   : > { %v4126_v4 = vpop.f32.mrb[4].mxu1 }
 0x211   : > { %v3242_v13 = vadd.f32 %v4126_v4, %v6120_v33  ;;  %v3233_v36 = vpop.f32.mrb[5].mxu1 }
 0x212   : > { %v4110_v1 = vpop.f32.mrb[4].mxu0  ;;  %v3234_v15 = vadd.f32 %v6120_v33, %v3233_v36  ;;  %v4127_v34 = vpop.f32.mrb[6].mxu1 }
 0x213   : > { %v3178_v30 = vadd.f32 %v4110_v1, %v6120_v33  ;;  %v3169_v27 = vpop.f32.mrb[5].mxu0  ;;  %v3245_v38 = vadd.f32 %v4127_v34, %v6120_v33  ;;  %v3236_v48 = vpop.f32.mrb[7].mxu1  ;;  %v3302_v28 = vmax.f32 %v3242_v13, 0.0 }
 0x214   : > { %v3170_v31 = vadd.f32 %v6120_v33, %v3169_v27  ;;  %v4111_v26 = vpop.f32.mrb[6].mxu0  ;;  %v3237_v63 = vadd.f32 %v6120_v33, %v3236_v48  ;;  %v3300_v62 = vmax.f32 %v3234_v15, 0.0 }
 0x215   : > { %v3181_v23 = vadd.f32 %v4111_v26, %v6120_v33  ;;  %v3172_v10 = vpop.f32.mrb[7].mxu0  ;;  %v3303_v37 = vmax.f32 %v3245_v38, 0.0  ;;  %v3286_v0 = vmax.f32 %v3178_v30, 0.0 }
 0x216   : > { %v3173_v52 = vadd.f32 %v6120_v33, %v3172_v10  ;;  %v3301_v45 = vmax.f32 %v3237_v63, 0.0  ;;  %v3284_v2 = vmax.f32 %v3170_v31, 0.0 }
 0x217   : > { %v3287_v55 = vmax.f32 %v3181_v23, 0.0  ;;  %v4042_v11 = vpack.c.bf16 %v3303_v37, %v3302_v28 }
 0x218   : > { %v3285_v47 = vmax.f32 %v3173_v52, 0.0  ;;  %v4037_v49 = vpack.c.bf16 %v3301_v45, %v3300_v62 }
 0x219   : > { %v4002_v29 = vpack.c.bf16 %v3287_v55, %v3286_v0  ;;  %4074 = vst [vmem:[%s6153_s12 + $0x58] sm:$0xff] %v4042_v11  }
 0x21a   : > { %v3997_v41 = vpack.c.bf16 %v3285_v47, %v3284_v2  ;;  %4073 = vst [vmem:[%s6153_s12 + $0x50] sm:$0xff] %v4037_v49  }
 0x21b   : > { %4066 = vst [vmem:[%s6153_s12 + $0x18] sm:$0xff] %v4002_v29  }
 0x21c   : > { %4065 = vst [vmem:[%s6153_s12 + $0x10] sm:$0xff] %v3997_v41  }
 0x24f   : > { %v4130_v46 = vpop.f32.mrb[8].mxu1 }
 0x250   : > { %v3258_v61 = vadd.f32 %v4130_v46, %v6120_v33  ;;  %v3249_v20 = vpop.f32.mrb[9].mxu1 }
 0x251   : > { %v3250_v53 = vadd.f32 %v6120_v33, %v3249_v20  ;;  %v4131_v12 = vpop.f32.mrb[10].mxu1 }
 0x252   : > { %v3261_v60 = vadd.f32 %v4131_v12, %v6120_v33  ;;  %v3252_v35 = vpop.f32.mrb[11].mxu1  ;;  %v3306_v40 = vmax.f32 %v3258_v61, 0.0 }
 0x253   : > { %v4114_v3 = vpop.f32.mrb[8].mxu0  ;;  %v3253_v17 = vadd.f32 %v6120_v33, %v3252_v35  ;;  %v3304_v44 = vmax.f32 %v3250_v53, 0.0 }
 0x254   : > { %v3194_v21 = vadd.f32 %v4114_v3, %v6120_v33  ;;  %v3185_v7 = vpop.f32.mrb[9].mxu0  ;;  %v3307_v54 = vmax.f32 %v3261_v60, 0.0 }
 0x255   : > { %v3186_v19 = vadd.f32 %v6120_v33, %v3185_v7  ;;  %v4115_v59 = vpop.f32.mrb[10].mxu0  ;;  %v3305_v22 = vmax.f32 %v3253_v17, 0.0 }
 0x256   : > { %v3197_v6 = vadd.f32 %v4115_v59, %v6120_v33  ;;  %v4052_v18 = vpack.c.bf16 %v3307_v54, %v3306_v40  ;;  %v3188_v57 = vpop.f32.mrb[11].mxu0  ;;  %v3290_v51 = vmax.f32 %v3194_v21, 0.0 }
 0x257   : > { %v3189_v43 = vadd.f32 %v6120_v33, %v3188_v57  ;;  %v4047_v8 = vpack.c.bf16 %v3305_v22, %v3304_v44  ;;  %v3288_v5 = vmax.f32 %v3186_v19, 0.0 }
 0x258   : > { %v3291_v32 = vmax.f32 %v3197_v6, 0.0  ;;  %4076 = vst [vmem:[%s6153_s12 + $0x68] sm:$0xff] %v4052_v18  }
 0x259   : > { %v3289_v56 = vmax.f32 %v3189_v43, 0.0  ;;  %4075 = vst [vmem:[%s6153_s12 + $0x60] sm:$0xff] %v4047_v8  }
 0x25a   : > { %v4012_v14 = vpack.c.bf16 %v3291_v32, %v3290_v51 }
 0x25b   : > { %v4007_v39 = vpack.c.bf16 %v3289_v56, %v3288_v5 }
 0x25c   : > { %4068 = vst [vmem:[%s6153_s12 + $0x28] sm:$0xff] %v4012_v14  }
 0x25d   : > { %4067 = vst [vmem:[%s6153_s12 + $0x20] sm:$0xff] %v4007_v39  }
 0x299   : > { %v4134_v42 = vpop.f32.mrb[12].mxu1 }
 0x29a   : > { %v3274_v9 = vadd.f32 %v4134_v42, %v6120_v33  ;;  %v3265_v24 = vpop.f32.mrb[13].mxu1 }
 0x29b   : > { %v3266_v16 = vadd.f32 %v6120_v33, %v3265_v24  ;;  %v4135_v50 = vpop.f32.mrb[14].mxu1 }
 0x29c   : > { %v4118_v58 = vpop.f32.mrb[12].mxu0  ;;  %v3277_v25 = vadd.f32 %v4135_v50, %v6120_v33  ;;  %v3268_v4 = vpop.f32.mrb[15].mxu1  ;;  %v3310_v30 = vmax.f32 %v3274_v9, 0.0 }
 0x29d   : > { %v3210_v1 = vadd.f32 %v4118_v58, %v6120_v33  ;;  %v3201_v13 = vpop.f32.mrb[13].mxu0  ;;  %v3269_v36 = vadd.f32 %v6120_v33, %v3268_v4  ;;  %v3308_v31 = vmax.f32 %v3266_v16, 0.0 }
 0x29e   : > { %v3202_v27 = vadd.f32 %v6120_v33, %v3201_v13  ;;  %v4119_v15 = vpop.f32.mrb[14].mxu0  ;;  %v3311_v34 = vmax.f32 %v3277_v25, 0.0 }
 0x29f   : > { %v3213_v26 = vadd.f32 %v4119_v15, %v6120_v33  ;;  %v3204_v38 = vpop.f32.mrb[15].mxu0  ;;  %v3309_v48 = vmax.f32 %v3269_v36, 0.0  ;;  %v3294_v63 = vmax.f32 %v3210_v1, 0.0 }
 0x2a0   : > { %v4062_v23 = vpack.c.bf16 %v3311_v34, %v3310_v30  ;;  %v3205_v10 = vadd.f32 %v6120_v33, %v3204_v38  ;;  %v3292_v52 = vmax.f32 %v3202_v27, 0.0 }
 0x2a1   : > { %v3295_v28 = vmax.f32 %v3213_v26, 0.0  ;;  %v4057_v37 = vpack.c.bf16 %v3309_v48, %v3308_v31 }
 0x2a2   : > { %4078 = vst [vmem:[%s6153_s12 + $0x78] sm:$0xff] %v4062_v23   ;;  %v3293_v0 = vmax.f32 %v3205_v10, 0.0 }
 0x2a3   : > { %v4022_v62 = vpack.c.bf16 %v3295_v28, %v3294_v63  ;;  %4077 = vst [vmem:[%s6153_s12 + $0x70] sm:$0xff] %v4057_v37  }
 0x2a4   : > { %v4017_v55 = vpack.c.bf16 %v3293_v0, %v3292_v52 }
 0x2a5   : > { %4070 = vst [vmem:[%s6153_s12 + $0x38] sm:$0xff] %v4022_v62  }
 0x2a6   : > { %4069 = vst [vmem:[%s6153_s12 + $0x30] sm:$0xff] %v4017_v55  }
 0x2a7 PF: > { %s13_s14 = sadd.s32 1, %s4278_s14   ;;  %s6213_s12 = smov %s4274_s13 }
 0x2a8   : > { %p10_p5 = scmp.ge.s32.totalorder %s13_s14, 4   ;;  %s6214_s13 = smov %s6216_s15 }
 0x2aa   :  { %12 = sbr.rel (!%p10_p5) target bundleno = 2 (0x2), region = 65 }

</bundles_post_ra>
